<compile_context>
chip_gen: v6e
topology: v6e:2x2x1
jax: 0.10.0
libtpu: 0.0.40
codegen_flags: <defaults>
</compile_context>

<pallas_src>
import functools

import jax
import jax.numpy as jnp
from jax.experimental import pallas as pl
from jax.experimental.pallas import tpu as pltpu


_LAYER_SALTS = (0x27D4EB2F, 0x165667B1, 0x9E3779B1, 0x85EBCA77, 0xC2B2AE3D)


# -----------------------------------------------------------------------------
# Kernel: whole 6-layer chain fused, weights fully VMEM-resident (max 128x128)
# -----------------------------------------------------------------------------
def mlp_kernel(seed_ref, x_ref, *refs, training, dropout_prob, use_bf16,
               batch_tile, max_hidden):
    param_refs = refs[:-1]
    o_ref = refs[-1]
    n_layers = len(param_refs) // 2

    compute_dtype = jnp.bfloat16 if use_bf16 else jnp.float32
    use_dropout = training and dropout_prob > 0.0

    if use_dropout:
        pid = pl.program_id(0)
        seed_u32 = seed_ref[0].astype(jnp.uint32)
        # Hoisted, layer-independent base mix at the widest hidden width.
        r = jax.lax.broadcasted_iota(
            jnp.int32, (batch_tile, max_hidden), 0).astype(jnp.uint32)
        c = jax.lax.broadcasted_iota(
            jnp.int32, (batch_tile, max_hidden), 1).astype(jnp.uint32)
        row = r + (pid * batch_tile).astype(jnp.uint32)   # global row index
        base = ((row * jnp.uint32(0x9E3779B1))
                ^ (c * jnp.uint32(0x85EBCA77))
                ^ (seed_u32 * jnp.uint32(0xC2B2AE3D)))
        keep_prob = 1.0 - float(dropout_prob)
        thr = jnp.uint32(min(int(round(keep_prob * 4294967296.0)), 4294967295))
        inv_keep = jnp.asarray(1.0 / keep_prob, dtype=compute_dtype)
        zero = jnp.asarray(0.0, dtype=compute_dtype)

    h = x_ref[...].astype(compute_dtype)
    for li in range(n_layers):
        w = param_refs[2 * li][...]                 # already in compute dtype
        b = param_refs[2 * li + 1][...]             # f32 bias
        acc = jnp.dot(h, w, preferred_element_type=jnp.float32)
        hf = acc + b.astype(jnp.float32)            # exact f32 bias-add
        if li < n_layers - 1:
            # ReLU (and dropout) in the compute dtype: one cast per layer.
            h = jnp.maximum(hf.astype(compute_dtype), 0)
            if use_dropout:
                width = h.shape[1]
                x32 = base[:, :width] ^ jnp.uint32(
                    _LAYER_SALTS[li % len(_LAYER_SALTS)])
                # murmur3 fmix32 finalizer
                x32 = x32 ^ (x32 >> 16)
                x32 = x32 * jnp.uint32(0x85EBCA6B)
                x32 = x32 ^ (x32 >> 13)
                x32 = x32 * jnp.uint32(0xC2B2AE35)
                x32 = x32 ^ (x32 >> 16)
                # Integer-domain threshold compare; 1/keep folded into select.
                h = h * jnp.where(x32 < thr, inv_keep, zero)
        else:
            h = hf
    o_ref[...] = h.astype(o_ref.dtype)


# -----------------------------------------------------------------------------
# Batch tiling (generation-aware)
# -----------------------------------------------------------------------------
def _is_two_tensorcore_chip():
    try:
        kind = jax.devices()[0].device_kind.lower()
    except Exception:  # pragma: no cover - defensive
        return False
    return "v7" in kind


def _pick_batch_tile(B, in_size, out_size):
    # Fat tiles amortize the ~0.35us per-grid-step overhead; the whole layer
    # chain + double-buffered x/out tiles fit trivially in VMEM even at 4096.
    vmem_budget = 24 * 1024 * 1024
    candidates = (4096, 2048, 1024, 512, 256, 128, 64, 32, 16, 8)

    def fits(tb):
        # double-buffered x/out tiles + widest (tb,128) activation in f32
        tile_bytes = 2 * tb * (in_size + out_size) * 4 + tb * 128 * 4
        return tile_bytes <= vmem_budget

    if _is_two_tensorcore_chip():
        # v7x: require an even grid length so the 'parallel' batch axis splits
        # evenly across the two TensorCores.
        for tb in candidates:
            if B % tb == 0 and (B // tb) % 2 == 0 and fits(tb):
                return tb
    # Single-TC chips (v5e/v6e), or no even split available: largest divisor
    # tile, grid=1 is fine (nothing worth pipelining once weights are resident).
    for tb in candidates:
        if B % tb == 0 and fits(tb):
            return tb
    return B


# -----------------------------------------------------------------------------
# Wrapper
# -----------------------------------------------------------------------------
def linear_model_with_dropout2(x, params, *, training=False, dropout_prob=0.1,
                               seed=0, batch_tile=None, use_bf16_matmul=True):
    """params: list of (W, b) with W shape (in, out), b shape (1, out)."""
    B, in_size = x.shape
    out_size = params[-1][0].shape[1]
    max_hidden = max(w.shape[1] for w, _ in params[:-1])

    tb = _pick_batch_tile(B, in_size, out_size) if batch_tile is None else batch_tile
    assert B % tb == 0, "batch must be divisible by batch_tile"

    # Pre-cast weights ONCE outside the kernel (halves weight DMA + removes
    # per-layer VPU converts); biases stay f32 for an exact f32 bias-add.
    wdtype = jnp.bfloat16 if use_bf16_matmul else jnp.float32
    flat_params = []
    for w, b in params:
        flat_params.append(w.astype(wdtype))
        flat_params.append(b.astype(jnp.float32))

    seed_arr = jnp.asarray([seed], dtype=jnp.int32)

    in_specs = [
        pl.BlockSpec(memory_space=pltpu.SMEM),              # seed (scalar)
        pl.BlockSpec((tb, in_size), lambda i: (i, 0)),      # x batch tile
    ]
    for p in flat_params:
        # Full tensor, constant index_map: fetched once, stays VMEM-resident.
        in_specs.append(pl.BlockSpec(p.shape, lambda i: (0, 0)))

    out_spec = pl.BlockSpec((tb, out_size), lambda i: (i, 0))

    flops = 2 * B * sum(w.shape[0] * w.shape[1] for w, _ in params)
    bytes_accessed = (x.size * x.dtype.itemsize
                      + B * out_size * x.dtype.itemsize
                      + sum(int(p.size) * p.dtype.itemsize for p in flat_params))
    cost = pl.CostEstimate(flops=int(flops), transcendentals=0,
                           bytes_accessed=int(bytes_accessed))

    kernel = functools.partial(mlp_kernel, training=training,
                               dropout_prob=float(dropout_prob),
                               use_bf16=use_bf16_matmul, batch_tile=tb,
                               max_hidden=max_hidden)

    return pl.pallas_call(
        kernel,
        out_shape=jax.ShapeDtypeStruct((B, out_size), x.dtype),
        grid=(B // tb,),
        in_specs=in_specs,
        out_specs=out_spec,
        compiler_params=pltpu.CompilerParams(
            dimension_semantics=("parallel",),
            vmem_limit_bytes=32 * 1024 * 1024),   # safe on v5e/v6e/v7x
        cost_estimate=cost,
    )(seed_arr, x, *flat_params)


# -----------------------------------------------------------------------------
# Deterministic parameter init (mimics PyTorch nn.Linear default init)
# -----------------------------------------------------------------------------
def init_params(key, input_size, output_size):
    dims = [input_size, 128, 64, 32, 64, 128, output_size]
    params = []
    for i in range(len(dims) - 1):
        fan_in, fan_out = dims[i], dims[i + 1]
        key, kw, kb = jax.random.split(key, 3)
        bound = 1.0 / (fan_in ** 0.5)
        w = jax.random.uniform(kw, (fan_in, fan_out), jnp.float32, -bound, bound)
        b = jax.random.uniform(kb, (1, fan_out), jnp.float32, -bound, bound)
        params.append((w, b))
    return params


# -----------------------------------------------------------------------------
# Pure-JAX reference (eval mode: dropout = identity)
# -----------------------------------------------------------------------------
def ref_forward(x, params, use_bf16=False):
    h = x.astype(jnp.float32)
    for i, (w, b) in enumerate(params):
        if use_bf16:
            h = jnp.dot(h.astype(jnp.bfloat16), w.astype(jnp.bfloat16),
                        preferred_element_type=jnp.float32) + b
        else:
            h = jnp.dot(h, w, preferred_element_type=jnp.float32,
                        precision=jax.lax.Precision.HIGHEST) + b
        if i < len(params) - 1:
            h = jnp.maximum(h, 0.0)
    return h


if __name__ == "__main__":
    input_size = 32
    output_size = 32
    batch = 512   # small, but enough rows to exercise the tiling logic

    key = jax.random.PRNGKey(0)
    key, kx = jax.random.split(key)
    x = jax.random.normal(kx, (batch, input_size), dtype=jnp.float32)
    params = init_params(key, input_size, output_size)

    # Eval mode, f32 matmul: strict check vs. pure-JAX reference.
    out_f32 = jax.block_until_ready(
        linear_model_with_dropout2(x, params, training=False,
                                   use_bf16_matmul=False))
    ref_f32 = ref_forward(x, params, use_bf16=False)
    assert out_f32.shape == (batch, output_size)
    assert jnp.allclose(out_f32, ref_f32, atol=1e-4, rtol=1e-4)

    # Eval mode, bf16-operand matmul (default perf path on v6e/v7x).
    out_bf16 = jax.block_until_ready(
        linear_model_with_dropout2(x, params, training=False))
    ref_bf16 = ref_forward(x, params, use_bf16=True)
    assert jnp.allclose(out_bf16, ref_bf16, atol=2e-2, rtol=2e-2)

    # Training mode: stochastic inverted dropout (deterministic given seed,
    # tile-invariant via global row index).
    out_train = jax.block_until_ready(
        linear_model_with_dropout2(x, params, training=True,
                                   dropout_prob=0.1, seed=123))
    assert out_train.shape == (batch, output_size)
    assert bool(jnp.all(jnp.isfinite(out_train)))

    # Tile-invariance smoke test: same seed, forced different tiling.
    out_train_tiled = jax.block_until_ready(
        linear_model_with_dropout2(x, params, training=True,
                                   dropout_prob=0.1, seed=123, batch_tile=128))
    assert jnp.allclose(out_train, out_train_tiled, atol=1e-2, rtol=1e-2)

    print("KERNEL_OK")
</pallas_src>

<mosaic_0001>
module attributes {stable_mosaic.version = 11 : i64} {
  func.func @mlp_kernel(%arg0: i32, %arg1: memref<1xi32, #tpu.memory_space<smem>>, %arg2: memref<512x32xf32, #tpu.memory_space<vmem>>, %arg3: memref<32x128xf32, #tpu.memory_space<vmem>>, %arg4: memref<1x128xf32, #tpu.memory_space<vmem>>, %arg5: memref<128x64xf32, #tpu.memory_space<vmem>>, %arg6: memref<1x64xf32, #tpu.memory_space<vmem>>, %arg7: memref<64x32xf32, #tpu.memory_space<vmem>>, %arg8: memref<1x32xf32, #tpu.memory_space<vmem>>, %arg9: memref<32x64xf32, #tpu.memory_space<vmem>>, %arg10: memref<1x64xf32, #tpu.memory_space<vmem>>, %arg11: memref<64x128xf32, #tpu.memory_space<vmem>>, %arg12: memref<1x128xf32, #tpu.memory_space<vmem>>, %arg13: memref<128x32xf32, #tpu.memory_space<vmem>>, %arg14: memref<1x32xf32, #tpu.memory_space<vmem>>, %arg15: memref<512x32xf32, #tpu.memory_space<vmem>>) attributes {dimension_semantics = [#tpu.dimension_semantics<parallel>], iteration_bounds = array<i64: 1>, scalar_prefetch = 0 : i64, scratch_operands = 0 : i64, tpu.core_type = #tpu.core_type<tc>, window_params = [{transform_indices = @transform_0, window_bounds = array<i64: 1>}, {transform_indices = @transform_1, window_bounds = array<i64: 512, 32>}, {pipeline_mode = #tpu.pipeline_mode<synchronous>, transform_indices = @transform_2, window_bounds = array<i64: 32, 128>}, {pipeline_mode = #tpu.pipeline_mode<synchronous>, transform_indices = @transform_3, window_bounds = array<i64: 1, 128>}, {pipeline_mode = #tpu.pipeline_mode<synchronous>, transform_indices = @transform_4, window_bounds = array<i64: 128, 64>}, {pipeline_mode = #tpu.pipeline_mode<synchronous>, transform_indices = @transform_5, window_bounds = array<i64: 1, 64>}, {pipeline_mode = #tpu.pipeline_mode<synchronous>, transform_indices = @transform_6, window_bounds = array<i64: 64, 32>}, {pipeline_mode = #tpu.pipeline_mode<synchronous>, transform_indices = @transform_7, window_bounds = array<i64: 1, 32>}, {pipeline_mode = #tpu.pipeline_mode<synchronous>, transform_indices = @transform_8, window_bounds = array<i64: 32, 64>}, {pipeline_mode = #tpu.pipeline_mode<synchronous>, transform_indices = @transform_9, window_bounds = array<i64: 1, 64>}, {pipeline_mode = #tpu.pipeline_mode<synchronous>, transform_indices = @transform_10, window_bounds = array<i64: 64, 128>}, {pipeline_mode = #tpu.pipeline_mode<synchronous>, transform_indices = @transform_11, window_bounds = array<i64: 1, 128>}, {pipeline_mode = #tpu.pipeline_mode<synchronous>, transform_indices = @transform_12, window_bounds = array<i64: 128, 32>}, {pipeline_mode = #tpu.pipeline_mode<synchronous>, transform_indices = @transform_13, window_bounds = array<i64: 1, 32>}, {transform_indices = @transform_14, window_bounds = array<i64: 512, 32>}]} {
    %c0 = arith.constant 0 : index
    %c0_0 = arith.constant 0 : index
    %0 = vector.load %arg2[%c0, %c0_0] : memref<512x32xf32, #tpu.memory_space<vmem>>, vector<512x32xf32>
    %c0_1 = arith.constant 0 : index
    %c0_2 = arith.constant 0 : index
    %1 = vector.load %arg3[%c0_1, %c0_2] : memref<32x128xf32, #tpu.memory_space<vmem>>, vector<32x128xf32>
    %c0_3 = arith.constant 0 : index
    %c0_4 = arith.constant 0 : index
    %2 = vector.load %arg4[%c0_3, %c0_4] : memref<1x128xf32, #tpu.memory_space<vmem>>, vector<1x128xf32>
    %cst = arith.constant dense<0.000000e+00> : vector<512x128xf32>
    %3 = tpu.matmul %0, %1, %cst {dimension_numbers = #tpu.dot_dimension_numbers<[1], [0], [0], [1], [0, 0, 1, 1], [], []>} : vector<512x32xf32>, vector<32x128xf32>, vector<512x128xf32> -> vector<512x128xf32>
    %4 = vector.broadcast %2 : vector<1x128xf32> to vector<512x128xf32>
    %5 = arith.addf %3, %4 : vector<512x128xf32>
    %cst_5 = arith.constant 0.000000e+00 : f32
    %6 = vector.broadcast %cst_5 : f32 to vector<512x128xf32>
    %7 = arith.maximumf %5, %6 : vector<512x128xf32>
    %c0_6 = arith.constant 0 : index
    %c0_7 = arith.constant 0 : index
    %8 = vector.load %arg5[%c0_6, %c0_7] : memref<128x64xf32, #tpu.memory_space<vmem>>, vector<128x64xf32>
    %c0_8 = arith.constant 0 : index
    %c0_9 = arith.constant 0 : index
    %9 = vector.load %arg6[%c0_8, %c0_9] : memref<1x64xf32, #tpu.memory_space<vmem>>, vector<1x64xf32>
    %cst_10 = arith.constant dense<0.000000e+00> : vector<512x64xf32>
    %10 = tpu.matmul %7, %8, %cst_10 {dimension_numbers = #tpu.dot_dimension_numbers<[1], [0], [0], [1], [0, 0, 1, 1], [], []>} : vector<512x128xf32>, vector<128x64xf32>, vector<512x64xf32> -> vector<512x64xf32>
    %11 = vector.broadcast %9 : vector<1x64xf32> to vector<512x64xf32>
    %12 = arith.addf %10, %11 : vector<512x64xf32>
    %cst_11 = arith.constant 0.000000e+00 : f32
    %13 = vector.broadcast %cst_11 : f32 to vector<512x64xf32>
    %14 = arith.maximumf %12, %13 : vector<512x64xf32>
    %c0_12 = arith.constant 0 : index
    %c0_13 = arith.constant 0 : index
    %15 = vector.load %arg7[%c0_12, %c0_13] : memref<64x32xf32, #tpu.memory_space<vmem>>, vector<64x32xf32>
    %c0_14 = arith.constant 0 : index
    %c0_15 = arith.constant 0 : index
    %16 = vector.load %arg8[%c0_14, %c0_15] : memref<1x32xf32, #tpu.memory_space<vmem>>, vector<1x32xf32>
    %cst_16 = arith.constant dense<0.000000e+00> : vector<512x32xf32>
    %17 = tpu.matmul %14, %15, %cst_16 {dimension_numbers = #tpu.dot_dimension_numbers<[1], [0], [0], [1], [0, 0, 1, 1], [], []>} : vector<512x64xf32>, vector<64x32xf32>, vector<512x32xf32> -> vector<512x32xf32>
    %18 = vector.broadcast %16 : vector<1x32xf32> to vector<512x32xf32>
    %19 = arith.addf %17, %18 : vector<512x32xf32>
    %cst_17 = arith.constant 0.000000e+00 : f32
    %20 = vector.broadcast %cst_17 : f32 to vector<512x32xf32>
    %21 = arith.maximumf %19, %20 : vector<512x32xf32>
    %c0_18 = arith.constant 0 : index
    %c0_19 = arith.constant 0 : index
    %22 = vector.load %arg9[%c0_18, %c0_19] : memref<32x64xf32, #tpu.memory_space<vmem>>, vector<32x64xf32>
    %c0_20 = arith.constant 0 : index
    %c0_21 = arith.constant 0 : index
    %23 = vector.load %arg10[%c0_20, %c0_21] : memref<1x64xf32, #tpu.memory_space<vmem>>, vector<1x64xf32>
    %cst_22 = arith.constant dense<0.000000e+00> : vector<512x64xf32>
    %24 = tpu.matmul %21, %22, %cst_22 {dimension_numbers = #tpu.dot_dimension_numbers<[1], [0], [0], [1], [0, 0, 1, 1], [], []>} : vector<512x32xf32>, vector<32x64xf32>, vector<512x64xf32> -> vector<512x64xf32>
    %25 = vector.broadcast %23 : vector<1x64xf32> to vector<512x64xf32>
    %26 = arith.addf %24, %25 : vector<512x64xf32>
    %cst_23 = arith.constant 0.000000e+00 : f32
    %27 = vector.broadcast %cst_23 : f32 to vector<512x64xf32>
    %28 = arith.maximumf %26, %27 : vector<512x64xf32>
    %c0_24 = arith.constant 0 : index
    %c0_25 = arith.constant 0 : index
    %29 = vector.load %arg11[%c0_24, %c0_25] : memref<64x128xf32, #tpu.memory_space<vmem>>, vector<64x128xf32>
    %c0_26 = arith.constant 0 : index
    %c0_27 = arith.constant 0 : index
    %30 = vector.load %arg12[%c0_26, %c0_27] : memref<1x128xf32, #tpu.memory_space<vmem>>, vector<1x128xf32>
    %cst_28 = arith.constant dense<0.000000e+00> : vector<512x128xf32>
    %31 = tpu.matmul %28, %29, %cst_28 {dimension_numbers = #tpu.dot_dimension_numbers<[1], [0], [0], [1], [0, 0, 1, 1], [], []>} : vector<512x64xf32>, vector<64x128xf32>, vector<512x128xf32> -> vector<512x128xf32>
    %32 = vector.broadcast %30 : vector<1x128xf32> to vector<512x128xf32>
    %33 = arith.addf %31, %32 : vector<512x128xf32>
    %cst_29 = arith.constant 0.000000e+00 : f32
    %34 = vector.broadcast %cst_29 : f32 to vector<512x128xf32>
    %35 = arith.maximumf %33, %34 : vector<512x128xf32>
    %c0_30 = arith.constant 0 : index
    %c0_31 = arith.constant 0 : index
    %36 = vector.load %arg13[%c0_30, %c0_31] : memref<128x32xf32, #tpu.memory_space<vmem>>, vector<128x32xf32>
    %c0_32 = arith.constant 0 : index
    %c0_33 = arith.constant 0 : index
    %37 = vector.load %arg14[%c0_32, %c0_33] : memref<1x32xf32, #tpu.memory_space<vmem>>, vector<1x32xf32>
    %cst_34 = arith.constant dense<0.000000e+00> : vector<512x32xf32>
    %38 = tpu.matmul %35, %36, %cst_34 {dimension_numbers = #tpu.dot_dimension_numbers<[1], [0], [0], [1], [0, 0, 1, 1], [], []>} : vector<512x128xf32>, vector<128x32xf32>, vector<512x32xf32> -> vector<512x32xf32>
    %39 = vector.broadcast %37 : vector<1x32xf32> to vector<512x32xf32>
    %40 = arith.addf %38, %39 : vector<512x32xf32>
    %c0_35 = arith.constant 0 : index
    %c0_36 = arith.constant 0 : index
    %41 = vector.load %arg15[%c0_35, %c0_36] : memref<512x32xf32, #tpu.memory_space<vmem>>, vector<512x32xf32>
    tpu.vector_store %arg15[%c0_35, %c0_36], %40 {strides = array<i32>} : memref<512x32xf32, #tpu.memory_space<vmem>>, vector<512x32xf32>,
    return
  }
  func.func @transform_0(%arg0: i32) -> i32 {
    %c0_i32 = arith.constant 0 : i32
    %c0_i32_0 = arith.constant 0 : i32
    return %c0_i32 : i32
  }
  func.func @transform_1(%arg0: i32) -> (i32, i32) {
    %c0_i32 = arith.constant 0 : i32
    %c0_i32_0 = arith.constant 0 : i32
    return %arg0, %c0_i32 : i32, i32
  }
  func.func @transform_2(%arg0: i32) -> (i32, i32) {
    %c0_i32 = arith.constant 0 : i32
    %c0_i32_0 = arith.constant 0 : i32
    %c0_i32_1 = arith.constant 0 : i32
    return %c0_i32, %c0_i32_0 : i32, i32
  }
  func.func @transform_3(%arg0: i32) -> (i32, i32) {
    %c0_i32 = arith.constant 0 : i32
    %c0_i32_0 = arith.constant 0 : i32
    %c0_i32_1 = arith.constant 0 : i32
    return %c0_i32, %c0_i32_0 : i32, i32
  }
  func.func @transform_4(%arg0: i32) -> (i32, i32) {
    %c0_i32 = arith.constant 0 : i32
    %c0_i32_0 = arith.constant 0 : i32
    %c0_i32_1 = arith.constant 0 : i32
    return %c0_i32, %c0_i32_0 : i32, i32
  }
  func.func @transform_5(%arg0: i32) -> (i32, i32) {
    %c0_i32 = arith.constant 0 : i32
    %c0_i32_0 = arith.constant 0 : i32
    %c0_i32_1 = arith.constant 0 : i32
    return %c0_i32, %c0_i32_0 : i32, i32
  }
  func.func @transform_6(%arg0: i32) -> (i32, i32) {
    %c0_i32 = arith.constant 0 : i32
    %c0_i32_0 = arith.constant 0 : i32
    %c0_i32_1 = arith.constant 0 : i32
    return %c0_i32, %c0_i32_0 : i32, i32
  }
  func.func @transform_7(%arg0: i32) -> (i32, i32) {
    %c0_i32 = arith.constant 0 : i32
    %c0_i32_0 = arith.constant 0 : i32
    %c0_i32_1 = arith.constant 0 : i32
    return %c0_i32, %c0_i32_0 : i32, i32
  }
  func.func @transform_8(%arg0: i32) -> (i32, i32) {
    %c0_i32 = arith.constant 0 : i32
    %c0_i32_0 = arith.constant 0 : i32
    %c0_i32_1 = arith.constant 0 : i32
    return %c0_i32, %c0_i32_0 : i32, i32
  }
  func.func @transform_9(%arg0: i32) -> (i32, i32) {
    %c0_i32 = arith.constant 0 : i32
    %c0_i32_0 = arith.constant 0 : i32
    %c0_i32_1 = arith.constant 0 : i32
    return %c0_i32, %c0_i32_0 : i32, i32
  }
  func.func @transform_10(%arg0: i32) -> (i32, i32) {
    %c0_i32 = arith.constant 0 : i32
    %c0_i32_0 = arith.constant 0 : i32
    %c0_i32_1 = arith.constant 0 : i32
    return %c0_i32, %c0_i32_0 : i32, i32
  }
  func.func @transform_11(%arg0: i32) -> (i32, i32) {
    %c0_i32 = arith.constant 0 : i32
    %c0_i32_0 = arith.constant 0 : i32
    %c0_i32_1 = arith.constant 0 : i32
    return %c0_i32, %c0_i32_0 : i32, i32
  }
  func.func @transform_12(%arg0: i32) -> (i32, i32) {
    %c0_i32 = arith.constant 0 : i32
    %c0_i32_0 = arith.constant 0 : i32
    %c0_i32_1 = arith.constant 0 : i32
    return %c0_i32, %c0_i32_0 : i32, i32
  }
  func.func @transform_13(%arg0: i32) -> (i32, i32) {
    %c0_i32 = arith.constant 0 : i32
    %c0_i32_0 = arith.constant 0 : i32
    %c0_i32_1 = arith.constant 0 : i32
    return %c0_i32, %c0_i32_0 : i32, i32
  }
  func.func @transform_14(%arg0: i32) -> (i32, i32) {
    %c0_i32 = arith.constant 0 : i32
    %c0_i32_0 = arith.constant 0 : i32
    return %arg0, %c0_i32 : i32, i32
  }
}

</mosaic_0001>

<bundles_post_ra>
// kernel: tpu_custom_call.1
= control target key start
LH: loop header
LB: loop body
LE: loop exit
PB: predicated region body
PF: predicated region fallthrough
CT: control target
= control target key end

     0   :  { %vm123_vm0 = vcmask 261120   ;;  %vm1252_vm1 = vcmask 523264   ;;  %s6527_s0 = inlined_call_operand.<no memory space> [shape: s32[1], index: 0, kind: input, shape index: {}]   ;;  %s6528_s2 = inlined_call_operand.vmem [shape: f32[32,128], index: 2, kind: input, shape index: {}]   ;;  %s6529_s1 = inlined_call_operand.vmem [shape: f32[512,32], index: 1, kind: input, shape index: {}]   ;;  %s6530_s4 = inlined_call_operand.vmem [shape: f32[128,64], index: 4, kind: input, shape index: {}]   ;;  %s6531_s6 = inlined_call_operand.vmem [shape: f32[64,32], index: 6, kind: input, shape index: {}]   ;;  %s6532_s3 = inlined_call_operand.vmem [shape: f32[1,128], index: 3, kind: input, shape index: {}]   ;;  %s6533_s8 = inlined_call_operand.vmem [shape: f32[32,64], index: 8, kind: input, shape index: {}]   ;;  %s6534_s5 = inlined_call_operand.vmem [shape: f32[1,64], index: 5, kind: input, shape index: {}]   ;;  %s6535_s10 = inlined_call_operand.vmem [shape: f32[64,128], index: 10, kind: input, shape index: {}]   ;;  %s6536_s7 = inlined_call_operand.vmem [shape: f32[1,32], index: 7, kind: input, shape index: {}]   ;;  %s6537_s12 = inlined_call_operand.vmem [shape: f32[128,32], index: 12, kind: input, shape index: {}]   ;;  %s6538_s9 = inlined_call_operand.vmem [shape: f32[1,64], index: 9, kind: input, shape index: {}]   ;;  %s6539_s11 = inlined_call_operand.vmem [shape: f32[1,128], index: 11, kind: input, shape index: {}]   ;;  %s6540_s13 = inlined_call_operand.vmem [shape: f32[1,32], index: 13, kind: input, shape index: {}]   ;;  %s6541_s14 = inlined_call_operand.vmem [shape: f32[512,32], index: 14, kind: output, shape index: {}]  }
   0x1   :  { %v115_v0 = vld [vmem:[%s6528_s2 + $0x18] sm:$0xff]  ;;  %v114_v1 = vld [vmem:[%s6528_s2 + $0x10] sm:$0xff]  ;;  %v48_v2 = vld [vmem:[%s6529_s1] sm:$0xff] }
   0x2   :  { %4380 = vmatprep.subr.mxu0 %v115_v0  ;;  %v113_v3 = vld [vmem:[%s6528_s2 + $0x8] sm:$0xff]  ;;  %4388 = vmatprep.mubr.msk.f32.mxu0 %vm123_vm0, %v48_v2  ;;  %v112_v4 = vld [vmem:[%s6528_s2] sm:$0xff]  ;;  %v50_v6 = vld [vmem:[%s6529_s1 + $0x10] sm:$0xff] }
   0x3   :  { %4381 = vmatpush3.msra.mxu0 %v115_v0  ;;  %v49_v5 = vld [vmem:[%s6529_s1 + $0x8] sm:$0xff]  ;;  %v51_v7 = vld [vmem:[%s6529_s1 + $0x18] sm:$0xff]  ;;  %v52_v8 = vld [vmem:[%s6529_s1 + $0x20] sm:$0xff] }
   0x4   :  { %4382 = vmatprep.subr.mxu0 %v114_v1  ;;  %v53_v9 = vld [vmem:[%s6529_s1 + $0x28] sm:$0xff]  ;;  %v54_v10 = vld [vmem:[%s6529_s1 + $0x30] sm:$0xff]  ;;  %v55_v11 = vld [vmem:[%s6529_s1 + $0x38] sm:$0xff] }
   0x5   :  { %4383 = vmatpush3.msra.mxu0 %v114_v1  ;;  %v56_v12 = vld [vmem:[%s6529_s1 + $0x40] sm:$0xff]  ;;  %v57_v13 = vld [vmem:[%s6529_s1 + $0x48] sm:$0xff]  ;;  %v780_v14 = vld [vmem:[%s6530_s4 + $0x78] sm:$0xff] }
   0x6   :  { %4384 = vmatprep.subr.mxu0 %v113_v3  ;;  %v58_v15 = vld [vmem:[%s6529_s1 + $0x50] sm:$0xff]  ;;  %4484 = vmatprep.subr.mxu1 %v780_v14  ;;  %v778_v17 = vld [vmem:[%s6530_s4 + $0x68] sm:$0xff]  ;;  %v59_v18 = vld [vmem:[%s6529_s1 + $0x58] sm:$0xff] }
   0x7   :  { %4385 = vmatpush3.msra.mxu0 %v113_v3  ;;  %v779_v16 = vld [vmem:[%s6530_s4 + $0x70] sm:$0xff]  ;;  %4485 = vmatpush3.msra.mxu1 %v780_v14  ;;  %v777_v19 = vld [vmem:[%s6530_s4 + $0x60] sm:$0xff]  ;;  %v776_v21 = vld [vmem:[%s6530_s4 + $0x58] sm:$0xff] }
   0x8   :  { %4386 = vmatprep.subr.mxu0 %v112_v4  ;;  %4486 = vmatprep.subr.mxu1 %v779_v16  ;;  %v60_v20 = vld [vmem:[%s6529_s1 + $0x60] sm:$0xff]  ;;  %v61_v22 = vld [vmem:[%s6529_s1 + $0x68] sm:$0xff]  ;;  %v775_v23 = vld [vmem:[%s6530_s4 + $0x50] sm:$0xff] }
   0x9   :  { %4387 = vmatpush3.msra.mxu0 %v112_v4  ;;  %4487 = vmatpush3.msra.mxu1 %v779_v16  ;;  %v62_v24 = vld [vmem:[%s6529_s1 + $0x70] sm:$0xff]  ;;  %v774_v25 = vld [vmem:[%s6530_s4 + $0x48] sm:$0xff]  ;;  %v63_v26 = vld [vmem:[%s6529_s1 + $0x78] sm:$0xff] }
   0xa   :  { %4389 = vmatmul.mubr.msk.f32.vlgmr.msra.gmra.mxu0 %vm123_vm0, %v49_v5  ;;  %4488 = vmatprep.subr.mxu1 %v778_v17  ;;  %v773_v27 = vld [vmem:[%s6530_s4 + $0x40] sm:$0xff]  ;;  %v772_v29 = vld [vmem:[%s6530_s4 + $0x38] sm:$0xff]  ;;  %v65_v30 = vld [vmem:[%s6529_s1 + $0x88] sm:$0xff] }
   0xb   :  { %4391 = vmatprep.mubr.msk.f32.mxu0 %vm123_vm0, %v50_v6  ;;  %4489 = vmatpush3.msra.mxu1 %v778_v17  ;;  %v64_v28 = vld [vmem:[%s6529_s1 + $0x80] sm:$0xff]  ;;  %v771_v31 = vld [vmem:[%s6530_s4 + $0x30] sm:$0xff]  ;;  %v770_v33 = vld [vmem:[%s6530_s4 + $0x28] sm:$0xff] }
   0xc   :  { %4490 = vmatprep.subr.mxu1 %v777_v19  ;;  %v66_v32 = vld [vmem:[%s6529_s1 + $0x90] sm:$0xff]  ;;  %v67_v34 = vld [vmem:[%s6529_s1 + $0x98] sm:$0xff]  ;;  %v769_v35 = vld [vmem:[%s6530_s4 + $0x20] sm:$0xff] }
   0xd   :  { %4491 = vmatpush3.msra.mxu1 %v777_v19  ;;  %v68_v36 = vld [vmem:[%s6529_s1 + $0xa0] sm:$0xff]  ;;  %v69_v37 = vld [vmem:[%s6529_s1 + $0xa8] sm:$0xff]  ;;  %v70_v38 = vld [vmem:[%s6529_s1 + $0xb0] sm:$0xff] }
   0xe   :  { %4392 = vmatmul.mubr.msk.f32.gmra.mxu0 %vm123_vm0, %v51_v7  ;;  %4492 = vmatprep.subr.mxu1 %v776_v21  ;;  %v71_v39 = vld [vmem:[%s6529_s1 + $0xb8] sm:$0xff]  ;;  %v72_v40 = vld [vmem:[%s6529_s1 + $0xc0] sm:$0xff]  ;;  %v73_v41 = vld [vmem:[%s6529_s1 + $0xc8] sm:$0xff] }
   0xf   :  { %4394 = vmatprep.mubr.msk.f32.mxu0 %vm123_vm0, %v52_v8  ;;  %4493 = vmatpush3.msra.mxu1 %v776_v21  ;;  %v74_v42 = vld [vmem:[%s6529_s1 + $0xd0] sm:$0xff]  ;;  %v75_v43 = vld [vmem:[%s6529_s1 + $0xd8] sm:$0xff]  ;;  %v76_v44 = vld [vmem:[%s6529_s1 + $0xe0] sm:$0xff] }
  0x10   :  { %4494 = vmatprep.subr.mxu1 %v775_v23  ;;  %v77_v45 = vld [vmem:[%s6529_s1 + $0xe8] sm:$0xff]  ;;  %v78_v46 = vld [vmem:[%s6529_s1 + $0xf0] sm:$0xff]  ;;  %v79_v47 = vld [vmem:[%s6529_s1 + $0xf8] sm:$0xff] }
  0x11   :  { %4495 = vmatpush3.msra.mxu1 %v775_v23  ;;  %v80_v48 = vld [vmem:[%s6529_s1 + $0x100] sm:$0xff]  ;;  %v81_v49 = vld [vmem:[%s6529_s1 + $0x108] sm:$0xff]  ;;  %v82_v50 = vld [vmem:[%s6529_s1 + $0x110] sm:$0xff] }
  0x12   :  { %4395 = vmatmul.mubr.msk.f32.gmra.mxu0 %vm123_vm0, %v53_v9  ;;  %4496 = vmatprep.subr.mxu1 %v774_v25  ;;  %v768_v51 = vld [vmem:[%s6530_s4 + $0x18] sm:$0xff]  ;;  %v767_v53 = vld [vmem:[%s6530_s4 + $0x10] sm:$0xff]  ;;  %v84_v54 = vld [vmem:[%s6529_s1 + $0x120] sm:$0xff] }
  0x13   :  { %4397 = vmatprep.mubr.msk.f32.mxu0 %vm123_vm0, %v54_v10  ;;  %4497 = vmatpush3.msra.mxu1 %v774_v25  ;;  %v83_v52 = vld [vmem:[%s6529_s1 + $0x118] sm:$0xff]  ;;  %v766_v55 = vld [vmem:[%s6530_s4 + $0x8] sm:$0xff]  ;;  %v765_v57 = vld [vmem:[%s6530_s4] sm:$0xff] }
  0x14   :  { %4498 = vmatprep.subr.mxu1 %v773_v27  ;;  %v85_v56 = vld [vmem:[%s6529_s1 + $0x128] sm:$0xff]  ;;  %v86_v58 = vld [vmem:[%s6529_s1 + $0x130] sm:$0xff]  ;;  %v87_v59 = vld [vmem:[%s6529_s1 + $0x138] sm:$0xff] }
  0x15   :  { %4499 = vmatpush3.msra.mxu1 %v773_v27  ;;  %v88_v60 = vld [vmem:[%s6529_s1 + $0x140] sm:$0xff]  ;;  %v89_v61 = vld [vmem:[%s6529_s1 + $0x148] sm:$0xff]  ;;  %v90_v62 = vld [vmem:[%s6529_s1 + $0x150] sm:$0xff] }
  0x16   :  { %4398 = vmatmul.mubr.msk.f32.gmra.mxu0 %vm123_vm0, %v55_v11  ;;  %4500 = vmatprep.subr.mxu1 %v772_v29  ;;  %v91_v63 = vld [vmem:[%s6529_s1 + $0x158] sm:$0xff]  ;;  %v92_v0 = vld [vmem:[%s6529_s1 + $0x160] sm:$0xff]  ;;  %v93_v1 = vld [vmem:[%s6529_s1 + $0x168] sm:$0xff] }
  0x17   :  { %4400 = vmatprep.mubr.msk.f32.mxu0 %vm123_vm0, %v56_v12  ;;  %4501 = vmatpush3.msra.mxu1 %v772_v29  ;;  %v94_v2 = vld [vmem:[%s6529_s1 + $0x170] sm:$0xff]  ;;  %v95_v3 = vld [vmem:[%s6529_s1 + $0x178] sm:$0xff]  ;;  %v96_v4 = vld [vmem:[%s6529_s1 + $0x180] sm:$0xff] }
  0x18   :  { %4502 = vmatprep.subr.mxu1 %v771_v31  ;;  %v97_v5 = vld [vmem:[%s6529_s1 + $0x188] sm:$0xff]  ;;  %v98_v6 = vld [vmem:[%s6529_s1 + $0x190] sm:$0xff]  ;;  %v99_v7 = vld [vmem:[%s6529_s1 + $0x198] sm:$0xff] }
  0x19   :  { %4503 = vmatpush3.msra.mxu1 %v771_v31  ;;  %v100_v8 = vld [vmem:[%s6529_s1 + $0x1a0] sm:$0xff]  ;;  %v101_v9 = vld [vmem:[%s6529_s1 + $0x1a8] sm:$0xff]  ;;  %v102_v10 = vld [vmem:[%s6529_s1 + $0x1b0] sm:$0xff] }
  0x1a   :  { %4401 = vmatmul.mubr.msk.f32.gmra.mxu0 %vm123_vm0, %v57_v13  ;;  %4504 = vmatprep.subr.mxu1 %v770_v33  ;;  %v103_v11 = vld [vmem:[%s6529_s1 + $0x1b8] sm:$0xff]  ;;  %v104_v12 = vld [vmem:[%s6529_s1 + $0x1c0] sm:$0xff]  ;;  %v105_v13 = vld [vmem:[%s6529_s1 + $0x1c8] sm:$0xff] }
  0x1b   :  { %4403 = vmatprep.mubr.msk.f32.mxu0 %vm123_vm0, %v58_v15  ;;  %4505 = vmatpush3.msra.mxu1 %v770_v33  ;;  %v106_v14 = vld [vmem:[%s6529_s1 + $0x1d0] sm:$0xff]  ;;  %v107_v15 = vld [vmem:[%s6529_s1 + $0x1d8] sm:$0xff]  ;;  %v108_v16 = vld [vmem:[%s6529_s1 + $0x1e0] sm:$0xff] }
  0x1c   :  { %4506 = vmatprep.subr.mxu1 %v769_v35  ;;  %v109_v17 = vld [vmem:[%s6529_s1 + $0x1e8] sm:$0xff]  ;;  %v111_v19 = vld [vmem:[%s6529_s1 + $0x1f8] sm:$0xff]  ;;  %v1243_v21 = vld [vmem:[%s6531_s6 + $0x30] sm:$0xff] }
  0x1d   :  { %4507 = vmatpush3.msra.mxu1 %v769_v35  ;;  %v5503_v23 = vld [vmem:[%s6532_s3] ss:$0 sm:$0xff]  ;;  %v1239_v31 = vld [vmem:[%s6531_s6 + $0x10] sm:$0xff] }
  0x1e   :  { %4404 = vmatmul.mubr.msk.f32.gmra.mxu0 %vm123_vm0, %v59_v18  ;;  %4508 = vmatprep.subr.mxu1 %v768_v51  ;;  %v110_v18 = vld [vmem:[%s6529_s1 + $0x1f0] sm:$0xff]  ;;  %v1241_v25 = vld [vmem:[%s6531_s6 + $0x20] sm:$0xff] }
  0x1f   :  { %4406 = vmatprep.mubr.msk.f32.mxu0 %vm123_vm0, %v60_v20  ;;  %4509 = vmatpush3.msra.mxu1 %v768_v51  ;;  %v1244_v20 = vld [vmem:[%s6531_s6 + $0x38] sm:$0xff] }
  0x20   :  { %4510 = vmatprep.subr.mxu1 %v767_v53  ;;  %4612 = vmatprep.subr.mxu0 %v1244_v20 }
  0x21   :  { %4511 = vmatpush3.msra.mxu1 %v767_v53  ;;  %4613 = vmatpush3.msra.mxu0 %v1244_v20 }
  0x22   :  { %4407 = vmatmul.mubr.msk.f32.gmra.mxu0 %vm123_vm0, %v61_v22  ;;  %4512 = vmatprep.subr.mxu1 %v766_v55  ;;  %v1242_v22 = vld [vmem:[%s6531_s6 + $0x28] sm:$0xff] }
  0x23   :  { %4409 = vmatprep.mubr.msk.f32.mxu0 %vm123_vm0, %v62_v24  ;;  %4513 = vmatpush3.msra.mxu1 %v766_v55 }
  0x24   :  { %4514 = vmatprep.subr.mxu1 %v765_v57  ;;  %4614 = vmatprep.subr.mxu0 %v1243_v21 }
  0x25   :  { %4515 = vmatpush3.msra.mxu1 %v765_v57  ;;  %4615 = vmatpush3.msra.mxu0 %v1243_v21 }
  0x26   :  { %4410 = vmatmul.mubr.msk.f32.gmra.mxu0 %vm123_vm0, %v63_v26  ;;  %4616 = vmatprep.subr.mxu0 %v1242_v22 }
  0x27   :  { %4412 = vmatprep.mubr.msk.f32.mxu0 %vm123_vm0, %v64_v28  ;;  %4617 = vmatpush3.msra.mxu0 %v1242_v22 }
  0x28   :  { %4618 = vmatprep.subr.mxu0 %v1241_v25 }
  0x29   :  { %4619 = vmatpush3.msra.mxu0 %v1241_v25 }
  0x2a   :  { %4413 = vmatmul.mubr.msk.f32.gmra.mxu0 %vm123_vm0, %v65_v30  ;;  %v1240_v30 = vld [vmem:[%s6531_s6 + $0x18] sm:$0xff] }
  0x2b   :  { %4415 = vmatprep.mubr.msk.f32.mxu0 %vm123_vm0, %v66_v32  ;;  %4620 = vmatprep.subr.mxu0 %v1240_v30 }
  0x2c   :  { %4621 = vmatpush3.msra.mxu0 %v1240_v30 }
  0x2d   :  { %4622 = vmatprep.subr.mxu0 %v1239_v31 }
  0x2e   :  { %4416 = vmatmul.mubr.msk.f32.gmra.mxu0 %vm123_vm0, %v67_v34 }
  0x2f   :  { %4418 = vmatprep.mubr.msk.f32.mxu0 %vm123_vm0, %v68_v36  ;;  %v1238_v36 = vld [vmem:[%s6531_s6 + $0x8] sm:$0xff]  ;;  %4623 = vmatpush3.msra.mxu0 %v1239_v31 }
  0x30   :  { %4624 = vmatprep.subr.mxu0 %v1238_v36 }
  0x31   :  { %4625 = vmatpush3.msra.mxu0 %v1238_v36 }
  0x32   :  { %4419 = vmatmul.mubr.msk.f32.gmra.mxu0 %vm123_vm0, %v69_v37 }
  0x33   :  { %4421 = vmatprep.mubr.msk.f32.mxu0 %vm123_vm0, %v70_v38 }
  0x36   :  { %4422 = vmatmul.mubr.msk.f32.gmra.mxu0 %vm123_vm0, %v71_v39  ;;  %v1237_v39 = vld [vmem:[%s6531_s6] sm:$0xff] }
  0x37   :  { %4424 = vmatprep.mubr.msk.f32.mxu0 %vm123_vm0, %v72_v40  ;;  %4626 = vmatprep.subr.mxu0 %v1237_v39 }
  0x38   :  { %4627 = vmatpush3.msra.mxu0 %v1237_v39 }
  0x3a   :  { %4425 = vmatmul.mubr.msk.f32.gmra.mxu0 %vm123_vm0, %v73_v41 }
  0x3b   :  { %4427 = vmatprep.mubr.msk.f32.mxu0 %vm123_vm0, %v74_v42 }
  0x3e   :  { %4428 = vmatmul.mubr.msk.f32.gmra.mxu0 %vm123_vm0, %v75_v43 }
  0x3f   :  { %4430 = vmatprep.mubr.msk.f32.mxu0 %vm123_vm0, %v76_v44 }
  0x42   :  { %4431 = vmatmul.mubr.msk.f32.gmra.mxu0 %vm123_vm0, %v77_v45 }
  0x43   :  { %4433 = vmatprep.mubr.msk.f32.mxu0 %vm123_vm0, %v78_v46 }
  0x46   :  { %4434 = vmatmul.mubr.msk.f32.gmra.mxu0 %vm123_vm0, %v79_v47 }
  0x47   :  { %4436 = vmatprep.mubr.msk.f32.mxu0 %vm123_vm0, %v80_v48 }
  0x4a   :  { %4437 = vmatmul.mubr.msk.f32.gmra.mxu0 %vm123_vm0, %v81_v49 }
  0x4b   :  { %4439 = vmatprep.mubr.msk.f32.mxu0 %vm123_vm0, %v82_v50 }
  0x4e   :  { %4440 = vmatmul.mubr.msk.f32.gmra.mxu0 %vm123_vm0, %v83_v52 }
  0x4f   :  { %4442 = vmatprep.mubr.msk.f32.mxu0 %vm123_vm0, %v84_v54 }
  0x52   :  { %4443 = vmatmul.mubr.msk.f32.gmra.mxu0 %vm123_vm0, %v85_v56 }
  0x53   :  { %4445 = vmatprep.mubr.msk.f32.mxu0 %vm123_vm0, %v86_v58 }
  0x56   :  { %4446 = vmatmul.mubr.msk.f32.gmra.mxu0 %vm123_vm0, %v87_v59 }
  0x57   :  { %4448 = vmatprep.mubr.msk.f32.mxu0 %vm123_vm0, %v88_v60 }
  0x5a   :  { %4449 = vmatmul.mubr.msk.f32.gmra.mxu0 %vm123_vm0, %v89_v61 }
  0x5b   :  { %4451 = vmatprep.mubr.msk.f32.mxu0 %vm123_vm0, %v90_v62 }
  0x5e   :  { %4452 = vmatmul.mubr.msk.f32.gmra.mxu0 %vm123_vm0, %v91_v63 }
  0x5f   :  { %4454 = vmatprep.mubr.msk.f32.mxu0 %vm123_vm0, %v92_v0 }
  0x62   :  { %4455 = vmatmul.mubr.msk.f32.gmra.mxu0 %vm123_vm0, %v93_v1 }
  0x63   :  { %4457 = vmatprep.mubr.msk.f32.mxu0 %vm123_vm0, %v94_v2 }
  0x66   :  { %4458 = vmatmul.mubr.msk.f32.gmra.mxu0 %vm123_vm0, %v95_v3 }
  0x67   :  { %4460 = vmatprep.mubr.msk.f32.mxu0 %vm123_vm0, %v96_v4 }
  0x6a   :  { %4461 = vmatmul.mubr.msk.f32.gmra.mxu0 %vm123_vm0, %v97_v5 }
  0x6b   :  { %4463 = vmatprep.mubr.msk.f32.mxu0 %vm123_vm0, %v98_v6 }
  0x6e   :  { %4464 = vmatmul.mubr.msk.f32.gmra.mxu0 %vm123_vm0, %v99_v7 }
  0x6f   :  { %4466 = vmatprep.mubr.msk.f32.mxu0 %vm123_vm0, %v100_v8 }
  0x72   :  { %4467 = vmatmul.mubr.msk.f32.gmra.mxu0 %vm123_vm0, %v101_v9 }
  0x73   :  { %4469 = vmatprep.mubr.msk.f32.mxu0 %vm123_vm0, %v102_v10 }
  0x76   :  { %4470 = vmatmul.mubr.msk.f32.gmra.mxu0 %vm123_vm0, %v103_v11 }
  0x77   :  { %4472 = vmatprep.mubr.msk.f32.mxu0 %vm123_vm0, %v104_v12 }
  0x7a   :  { %4473 = vmatmul.mubr.msk.f32.gmra.mxu0 %vm123_vm0, %v105_v13 }
  0x7b   :  { %4475 = vmatprep.mubr.msk.f32.mxu0 %vm123_vm0, %v106_v14 }
  0x7e   :  { %4476 = vmatmul.mubr.msk.f32.gmra.mxu0 %vm123_vm0, %v107_v15 }
  0x7f   :  { %4478 = vmatprep.mubr.msk.f32.mxu0 %vm123_vm0, %v108_v16 }
  0x82   :  { %4479 = vmatmul.mubr.msk.f32.gmra.mxu0 %vm123_vm0, %v109_v17 }
  0x83   :  { %4481 = vmatprep.mubr.msk.f32.mxu0 %vm123_vm0, %v110_v18 }
  0x86   :  { %4482 = vmatmul.mubr.msk.f32.gmra.mxu0 %vm123_vm0, %v111_v19 }
  0xca   :  { %v4390_v24 = vpop.f32.mrf.mxu0 }
  0xcb   :  { %v388_v26 = vadd.f32 %v4390_v24, %v5503_v23 }
  0xcc   :  { %v382_v27 = vpop.f32.mrf.mxu0 }
  0xcd   :  { %v383_v28 = vadd.f32 %v5503_v23, %v382_v27  ;;  %v702_v33 = vmax.f32 %v388_v26, 0.0 }
  0xce   :  { %v4393_v29 = vpop.f32.mrf.mxu0 }
  0xcf   :  { %v701_v32 = vmax.f32 %v383_v28, 0.0  ;;  %v398_v34 = vadd.f32 %v4393_v29, %v5503_v23 }
  0xd0   :  { %v392_v35 = vpop.f32.mrf.mxu0 }
  0xd1   :  { %v393_v37 = vadd.f32 %v5503_v23, %v392_v35  ;;  %4516 = vmatprep.mubr.f32.mxu1 %v701_v32  ;;  %v704_v41 = vmax.f32 %v398_v34, 0.0 }
  0xd2   :  { %v4396_v38 = vpop.f32.mrf.mxu0  ;;  %4517 = vmatmul.mubr.f32.vlgmr.msra.gmra.mxu1 %v702_v33 }
  0xd3   :  { %v703_v40 = vmax.f32 %v393_v37, 0.0  ;;  %v408_v42 = vadd.f32 %v4396_v38, %v5503_v23 }
  0xd4   :  { %v402_v43 = vpop.f32.mrf.mxu0 }
  0xd5   :  { %v403_v44 = vadd.f32 %v5503_v23, %v402_v43  ;;  %4519 = vmatprep.mubr.f32.mxu1 %v703_v40  ;;  %v706_v47 = vmax.f32 %v408_v42, 0.0 }
  0xd6   :  { %v4399_v45 = vpop.f32.mrf.mxu0  ;;  %4520 = vmatmul.mubr.f32.gmra.mxu1 %v704_v41 }
  0xd7   :  { %v705_v46 = vmax.f32 %v403_v44, 0.0  ;;  %v418_v48 = vadd.f32 %v4399_v45, %v5503_v23 }
  0xd8   :  { %v412_v49 = vpop.f32.mrf.mxu0 }
  0xd9   :  { %v413_v50 = vadd.f32 %v5503_v23, %v412_v49  ;;  %4522 = vmatprep.mubr.f32.mxu1 %v705_v46  ;;  %v708_v53 = vmax.f32 %v418_v48, 0.0 }
  0xda   :  { %v4402_v51 = vpop.f32.mrf.mxu0  ;;  %4523 = vmatmul.mubr.f32.gmra.mxu1 %v706_v47 }
  0xdb   :  { %v707_v52 = vmax.f32 %v413_v50, 0.0  ;;  %v428_v54 = vadd.f32 %v4402_v51, %v5503_v23 }
  0xdc   :  { %v422_v55 = vpop.f32.mrf.mxu0 }
  0xdd   :  { %v423_v56 = vadd.f32 %v5503_v23, %v422_v55  ;;  %4525 = vmatprep.mubr.f32.mxu1 %v707_v52  ;;  %v710_v59 = vmax.f32 %v428_v54, 0.0 }
  0xde   :  { %v4405_v57 = vpop.f32.mrf.mxu0  ;;  %4526 = vmatmul.mubr.f32.gmra.mxu1 %v708_v53 }
  0xdf   :  { %v709_v58 = vmax.f32 %v423_v56, 0.0  ;;  %v438_v60 = vadd.f32 %v4405_v57, %v5503_v23 }
  0xe0   :  { %v432_v61 = vpop.f32.mrf.mxu0 }
  0xe1   :  { %v433_v62 = vadd.f32 %v5503_v23, %v432_v61  ;;  %4528 = vmatprep.mubr.f32.mxu1 %v709_v58  ;;  %v712_v1 = vmax.f32 %v438_v60, 0.0 }
  0xe2   :  { %v4408_v63 = vpop.f32.mrf.mxu0  ;;  %4529 = vmatmul.mubr.f32.gmra.mxu1 %v710_v59 }
  0xe3   :  { %v711_v0 = vmax.f32 %v433_v62, 0.0  ;;  %v448_v2 = vadd.f32 %v4408_v63, %v5503_v23 }
  0xe4   :  { %v442_v3 = vpop.f32.mrf.mxu0 }
  0xe5   :  { %v443_v4 = vadd.f32 %v5503_v23, %v442_v3  ;;  %4531 = vmatprep.mubr.f32.mxu1 %v711_v0  ;;  %v714_v7 = vmax.f32 %v448_v2, 0.0 }
  0xe6   :  { %v4411_v5 = vpop.f32.mrf.mxu0  ;;  %4532 = vmatmul.mubr.f32.gmra.mxu1 %v712_v1 }
  0xe7   :  { %v713_v6 = vmax.f32 %v443_v4, 0.0  ;;  %v458_v8 = vadd.f32 %v4411_v5, %v5503_v23 }
  0xe8   :  { %v452_v9 = vpop.f32.mrf.mxu0 }
  0xe9   :  { %v453_v10 = vadd.f32 %v5503_v23, %v452_v9  ;;  %4534 = vmatprep.mubr.f32.mxu1 %v713_v6  ;;  %v716_v13 = vmax.f32 %v458_v8, 0.0 }
  0xea   :  { %v4414_v11 = vpop.f32.mrf.mxu0  ;;  %4535 = vmatmul.mubr.f32.gmra.mxu1 %v714_v7 }
  0xeb   :  { %v715_v12 = vmax.f32 %v453_v10, 0.0  ;;  %v468_v14 = vadd.f32 %v4414_v11, %v5503_v23 }
  0xec   :  { %v462_v15 = vpop.f32.mrf.mxu0 }
  0xed   :  { %v463_v16 = vadd.f32 %v5503_v23, %v462_v15  ;;  %4537 = vmatprep.mubr.f32.mxu1 %v715_v12  ;;  %v718_v19 = vmax.f32 %v468_v14, 0.0 }
  0xee   :  { %v4417_v17 = vpop.f32.mrf.mxu0  ;;  %4538 = vmatmul.mubr.f32.gmra.mxu1 %v716_v13 }
  0xef   :  { %v717_v18 = vmax.f32 %v463_v16, 0.0  ;;  %v478_v20 = vadd.f32 %v4417_v17, %v5503_v23 }
  0xf0   :  { %v472_v21 = vpop.f32.mrf.mxu0 }
  0xf1   :  { %v473_v22 = vadd.f32 %v5503_v23, %v472_v21  ;;  %4540 = vmatprep.mubr.f32.mxu1 %v717_v18  ;;  %v720_v26 = vmax.f32 %v478_v20, 0.0 }
  0xf2   :  { %v4420_v24 = vpop.f32.mrf.mxu0  ;;  %4541 = vmatmul.mubr.f32.gmra.mxu1 %v718_v19 }
  0xf3   :  { %v719_v25 = vmax.f32 %v473_v22, 0.0  ;;  %v488_v27 = vadd.f32 %v4420_v24, %v5503_v23 }
  0xf4   :  { %v482_v28 = vpop.f32.mrf.mxu0 }
  0xf5   :  { %v483_v29 = vadd.f32 %v5503_v23, %v482_v28  ;;  %4543 = vmatprep.mubr.f32.mxu1 %v719_v25  ;;  %v722_v32 = vmax.f32 %v488_v27, 0.0 }
  0xf6   :  { %v4423_v30 = vpop.f32.mrf.mxu0  ;;  %4544 = vmatmul.mubr.f32.gmra.mxu1 %v720_v26 }
  0xf7   :  { %v721_v31 = vmax.f32 %v483_v29, 0.0  ;;  %v498_v33 = vadd.f32 %v4423_v30, %v5503_v23 }
  0xf8   :  { %v492_v34 = vpop.f32.mrf.mxu0 }
  0xf9   :  { %v493_v35 = vadd.f32 %v5503_v23, %v492_v34  ;;  %4546 = vmatprep.mubr.f32.mxu1 %v721_v31  ;;  %v724_v38 = vmax.f32 %v498_v33, 0.0 }
  0xfa   :  { %v4426_v36 = vpop.f32.mrf.mxu0  ;;  %4547 = vmatmul.mubr.f32.gmra.mxu1 %v722_v32 }
  0xfb   :  { %v723_v37 = vmax.f32 %v493_v35, 0.0  ;;  %v508_v39 = vadd.f32 %v4426_v36, %v5503_v23 }
  0xfc   :  { %v502_v40 = vpop.f32.mrf.mxu0 }
  0xfd   :  { %v503_v41 = vadd.f32 %v5503_v23, %v502_v40  ;;  %4549 = vmatprep.mubr.f32.mxu1 %v723_v37  ;;  %v726_v44 = vmax.f32 %v508_v39, 0.0 }
  0xfe   :  { %v4429_v42 = vpop.f32.mrf.mxu0  ;;  %4550 = vmatmul.mubr.f32.gmra.mxu1 %v724_v38 }
  0xff   :  { %v725_v43 = vmax.f32 %v503_v41, 0.0  ;;  %v518_v45 = vadd.f32 %v4429_v42, %v5503_v23 }
 0x100   :  { %v512_v46 = vpop.f32.mrf.mxu0 }
 0x101   :  { %v513_v47 = vadd.f32 %v5503_v23, %v512_v46  ;;  %4552 = vmatprep.mubr.f32.mxu1 %v725_v43  ;;  %v728_v50 = vmax.f32 %v518_v45, 0.0 }
 0x102   :  { %v4432_v48 = vpop.f32.mrf.mxu0  ;;  %4553 = vmatmul.mubr.f32.gmra.mxu1 %v726_v44 }
 0x103   :  { %v727_v49 = vmax.f32 %v513_v47, 0.0  ;;  %v528_v51 = vadd.f32 %v4432_v48, %v5503_v23 }
 0x104   :  { %v522_v52 = vpop.f32.mrf.mxu0 }
 0x105   :  { %v523_v53 = vadd.f32 %v5503_v23, %v522_v52  ;;  %4555 = vmatprep.mubr.f32.mxu1 %v727_v49  ;;  %v730_v56 = vmax.f32 %v528_v51, 0.0 }
 0x106   :  { %v4435_v54 = vpop.f32.mrf.mxu0  ;;  %4556 = vmatmul.mubr.f32.gmra.mxu1 %v728_v50 }
 0x107   :  { %v729_v55 = vmax.f32 %v523_v53, 0.0  ;;  %v538_v57 = vadd.f32 %v4435_v54, %v5503_v23 }
 0x108   :  { %v532_v58 = vpop.f32.mrf.mxu0 }
 0x109   :  { %v533_v59 = vadd.f32 %v5503_v23, %v532_v58  ;;  %4558 = vmatprep.mubr.f32.mxu1 %v729_v55  ;;  %v732_v62 = vmax.f32 %v538_v57, 0.0 }
 0x10a   :  { %v4438_v60 = vpop.f32.mrf.mxu0  ;;  %4559 = vmatmul.mubr.f32.gmra.mxu1 %v730_v56 }
 0x10b   :  { %v731_v61 = vmax.f32 %v533_v59, 0.0  ;;  %v548_v63 = vadd.f32 %v4438_v60, %v5503_v23 }
 0x10c   :  { %v542_v0 = vpop.f32.mrf.mxu0 }
 0x10d   :  { %v543_v1 = vadd.f32 %v5503_v23, %v542_v0  ;;  %4561 = vmatprep.mubr.f32.mxu1 %v731_v61  ;;  %v734_v4 = vmax.f32 %v548_v63, 0.0 }
 0x10e   :  { %v4441_v2 = vpop.f32.mrf.mxu0  ;;  %4562 = vmatmul.mubr.f32.gmra.mxu1 %v732_v62 }
 0x10f   :  { %v733_v3 = vmax.f32 %v543_v1, 0.0  ;;  %v558_v5 = vadd.f32 %v4441_v2, %v5503_v23 }
 0x110   :  { %v552_v6 = vpop.f32.mrf.mxu0 }
 0x111   :  { %v553_v7 = vadd.f32 %v5503_v23, %v552_v6  ;;  %4564 = vmatprep.mubr.f32.mxu1 %v733_v3  ;;  %v736_v10 = vmax.f32 %v558_v5, 0.0 }
 0x112   :  { %v4444_v8 = vpop.f32.mrf.mxu0  ;;  %4565 = vmatmul.mubr.f32.gmra.mxu1 %v734_v4 }
 0x113   :  { %v735_v9 = vmax.f32 %v553_v7, 0.0  ;;  %v568_v11 = vadd.f32 %v4444_v8, %v5503_v23 }
 0x114   :  { %v562_v12 = vpop.f32.mrf.mxu0 }
 0x115   :  { %v563_v13 = vadd.f32 %v5503_v23, %v562_v12  ;;  %4567 = vmatprep.mubr.f32.mxu1 %v735_v9  ;;  %v738_v16 = vmax.f32 %v568_v11, 0.0 }
 0x116   :  { %v4447_v14 = vpop.f32.mrf.mxu0  ;;  %4568 = vmatmul.mubr.f32.gmra.mxu1 %v736_v10 }
 0x117   :  { %v737_v15 = vmax.f32 %v563_v13, 0.0  ;;  %v578_v17 = vadd.f32 %v4447_v14, %v5503_v23 }
 0x118   :  { %v572_v18 = vpop.f32.mrf.mxu0 }
 0x119   :  { %v573_v19 = vadd.f32 %v5503_v23, %v572_v18  ;;  %4570 = vmatprep.mubr.f32.mxu1 %v737_v15  ;;  %v740_v22 = vmax.f32 %v578_v17, 0.0 }
 0x11a   :  { %v4450_v20 = vpop.f32.mrf.mxu0  ;;  %4571 = vmatmul.mubr.f32.gmra.mxu1 %v738_v16 }
 0x11b   :  { %v739_v21 = vmax.f32 %v573_v19, 0.0  ;;  %v588_v24 = vadd.f32 %v4450_v20, %v5503_v23 }
 0x11c   :  { %v582_v25 = vpop.f32.mrf.mxu0 }
 0x11d   :  { %v583_v26 = vadd.f32 %v5503_v23, %v582_v25  ;;  %4573 = vmatprep.mubr.f32.mxu1 %v739_v21  ;;  %v742_v29 = vmax.f32 %v588_v24, 0.0 }
 0x11e   :  { %v4453_v27 = vpop.f32.mrf.mxu0  ;;  %4574 = vmatmul.mubr.f32.gmra.mxu1 %v740_v22 }
 0x11f   :  { %v741_v28 = vmax.f32 %v583_v26, 0.0  ;;  %v598_v30 = vadd.f32 %v4453_v27, %v5503_v23 }
 0x120   :  { %v592_v31 = vpop.f32.mrf.mxu0 }
 0x121   :  { %v593_v32 = vadd.f32 %v5503_v23, %v592_v31  ;;  %4576 = vmatprep.mubr.f32.mxu1 %v741_v28  ;;  %v744_v35 = vmax.f32 %v598_v30, 0.0 }
 0x122   :  { %v4456_v33 = vpop.f32.mrf.mxu0  ;;  %4577 = vmatmul.mubr.f32.gmra.mxu1 %v742_v29 }
 0x123   :  { %v743_v34 = vmax.f32 %v593_v32, 0.0  ;;  %v608_v36 = vadd.f32 %v4456_v33, %v5503_v23  ;;  %v1897_v32 = vld [vmem:[%s6533_s8 + $0x18] sm:$0xff]  ;;  %v1896_v33 = vld [vmem:[%s6533_s8 + $0x10] sm:$0xff] }
 0x124   :  { %v602_v37 = vpop.f32.mrf.mxu0  ;;  %4724 = vmatprep.subr.mxu1 %v1897_v32 }
 0x125   :  { %v603_v38 = vadd.f32 %v5503_v23, %v602_v37  ;;  %4579 = vmatprep.mubr.f32.mxu1 %v743_v34  ;;  %v746_v41 = vmax.f32 %v608_v36, 0.0  ;;  %4725 = vmatpush3.msra.mxu1 %v1897_v32 }
 0x126   :  { %v4459_v39 = vpop.f32.mrf.mxu0  ;;  %4580 = vmatmul.mubr.f32.gmra.mxu1 %v744_v35  ;;  %4726 = vmatprep.subr.mxu1 %v1896_v33 }
 0x127   :  { %v745_v40 = vmax.f32 %v603_v38, 0.0  ;;  %v618_v42 = vadd.f32 %v4459_v39, %v5503_v23  ;;  %4727 = vmatpush3.msra.mxu1 %v1896_v33  ;;  %v1895_v39 = vld [vmem:[%s6533_s8 + $0x8] sm:$0xff] }
 0x128   :  { %v612_v43 = vpop.f32.mrf.mxu0  ;;  %4728 = vmatprep.subr.mxu1 %v1895_v39 }
 0x129   :  { %v613_v44 = vadd.f32 %v5503_v23, %v612_v43  ;;  %4582 = vmatprep.mubr.f32.mxu1 %v745_v40  ;;  %v748_v47 = vmax.f32 %v618_v42, 0.0  ;;  %v1894_v40 = vld [vmem:[%s6533_s8] sm:$0xff]  ;;  %4729 = vmatpush3.msra.mxu1 %v1895_v39 }
 0x12a   :  { %v4462_v45 = vpop.f32.mrf.mxu0  ;;  %4583 = vmatmul.mubr.f32.gmra.mxu1 %v746_v41  ;;  %4730 = vmatprep.subr.mxu1 %v1894_v40 }
 0x12b   :  { %v747_v46 = vmax.f32 %v613_v44, 0.0  ;;  %v628_v48 = vadd.f32 %v4462_v45, %v5503_v23  ;;  %4731 = vmatpush3.msra.mxu1 %v1894_v40 }
 0x12c   :  { %v622_v49 = vpop.f32.mrf.mxu0 }
 0x12d   :  { %v623_v50 = vadd.f32 %v5503_v23, %v622_v49  ;;  %4585 = vmatprep.mubr.f32.mxu1 %v747_v46  ;;  %v750_v53 = vmax.f32 %v628_v48, 0.0 }
 0x12e   :  { %v4465_v51 = vpop.f32.mrf.mxu0  ;;  %4586 = vmatmul.mubr.f32.gmra.mxu1 %v748_v47 }
 0x12f   :  { %v749_v52 = vmax.f32 %v623_v50, 0.0  ;;  %v638_v54 = vadd.f32 %v4465_v51, %v5503_v23 }
 0x130   :  { %v632_v55 = vpop.f32.mrf.mxu0 }
 0x131   :  { %v633_v56 = vadd.f32 %v5503_v23, %v632_v55  ;;  %4588 = vmatprep.mubr.f32.mxu1 %v749_v52  ;;  %v752_v59 = vmax.f32 %v638_v54, 0.0 }
 0x132   :  { %v4468_v57 = vpop.f32.mrf.mxu0  ;;  %4589 = vmatmul.mubr.f32.gmra.mxu1 %v750_v53 }
 0x133   :  { %v751_v58 = vmax.f32 %v633_v56, 0.0  ;;  %v648_v60 = vadd.f32 %v4468_v57, %v5503_v23 }
 0x134   :  { %v642_v61 = vpop.f32.mrf.mxu0 }
 0x135   :  { %v643_v62 = vadd.f32 %v5503_v23, %v642_v61  ;;  %4591 = vmatprep.mubr.f32.mxu1 %v751_v58  ;;  %v754_v1 = vmax.f32 %v648_v60, 0.0 }
 0x136   :  { %v4471_v63 = vpop.f32.mrf.mxu0  ;;  %4592 = vmatmul.mubr.f32.gmra.mxu1 %v752_v59 }
 0x137   :  { %v753_v0 = vmax.f32 %v643_v62, 0.0  ;;  %v658_v2 = vadd.f32 %v4471_v63, %v5503_v23 }
 0x138   :  { %v652_v3 = vpop.f32.mrf.mxu0 }
 0x139   :  { %v653_v4 = vadd.f32 %v5503_v23, %v652_v3  ;;  %4594 = vmatprep.mubr.f32.mxu1 %v753_v0  ;;  %v756_v7 = vmax.f32 %v658_v2, 0.0 }
 0x13a   :  { %v4474_v5 = vpop.f32.mrf.mxu0  ;;  %4595 = vmatmul.mubr.f32.gmra.mxu1 %v754_v1 }
 0x13b   :  { %v755_v6 = vmax.f32 %v653_v4, 0.0  ;;  %v668_v8 = vadd.f32 %v4474_v5, %v5503_v23 }
 0x13c   :  { %v662_v9 = vpop.f32.mrf.mxu0 }
 0x13d   :  { %v663_v10 = vadd.f32 %v5503_v23, %v662_v9  ;;  %4597 = vmatprep.mubr.f32.mxu1 %v755_v6  ;;  %v758_v13 = vmax.f32 %v668_v8, 0.0 }
 0x13e   :  { %v4477_v11 = vpop.f32.mrf.mxu0  ;;  %4598 = vmatmul.mubr.f32.gmra.mxu1 %v756_v7 }
 0x13f   :  { %v757_v12 = vmax.f32 %v663_v10, 0.0  ;;  %v678_v14 = vadd.f32 %v4477_v11, %v5503_v23 }
 0x140   :  { %v672_v15 = vpop.f32.mrf.mxu0 }
 0x141   :  { %v673_v16 = vadd.f32 %v5503_v23, %v672_v15  ;;  %4600 = vmatprep.mubr.f32.mxu1 %v757_v12  ;;  %v760_v19 = vmax.f32 %v678_v14, 0.0 }
 0x142   :  { %v4480_v17 = vpop.f32.mrf.mxu0  ;;  %4601 = vmatmul.mubr.f32.gmra.mxu1 %v758_v13 }
 0x143   :  { %v759_v18 = vmax.f32 %v673_v16, 0.0  ;;  %v688_v20 = vadd.f32 %v4480_v17, %v5503_v23 }
 0x144   :  { %v682_v21 = vpop.f32.mrf.mxu0 }
 0x145   :  { %v683_v22 = vadd.f32 %v5503_v23, %v682_v21  ;;  %4603 = vmatprep.mubr.f32.mxu1 %v759_v18  ;;  %v762_v26 = vmax.f32 %v688_v20, 0.0 }
 0x146   :  { %v4483_v24 = vpop.f32.mrf.mxu0  ;;  %4604 = vmatmul.mubr.f32.gmra.mxu1 %v760_v19 }
 0x147   :  { %v761_v25 = vmax.f32 %v683_v22, 0.0  ;;  %v698_v27 = vadd.f32 %v4483_v24, %v5503_v23 }
 0x148   :  { %v692_v28 = vpop.f32.mrf.mxu0 }
 0x149   :  { %v693_v29 = vadd.f32 %v5503_v23, %v692_v28  ;;  %4606 = vmatprep.mubr.f32.mxu1 %v761_v25  ;;  %v764_v31 = vmax.f32 %v698_v27, 0.0  ;;  %v5593_v23 = vld [vmem:[%s6534_s5] ss:$0 sm:$0xff] }
 0x14a   :  { %4607 = vmatmul.mubr.f32.gmra.mxu1 %v762_v26 }
 0x14b   :  { %v763_v30 = vmax.f32 %v693_v29, 0.0 }
 0x14d   :  { %4609 = vmatprep.mubr.f32.mxu1 %v763_v30 }
 0x14e   :  { %4610 = vmatmul.mubr.f32.gmra.mxu1 %v764_v31 }
 0x192   :  { %v4518_v34 = vpop.f32.mrf.mxu1 }
 0x193   :  { %v860_v35 = vadd.f32 %v4518_v34, %v5593_v23 }
 0x194   :  { %v854_v36 = vpop.f32.mrf.mxu1 }
 0x195   :  { %v855_v37 = vadd.f32 %v5593_v23, %v854_v36  ;;  %v1174_v42 = vmax.f32 %v860_v35, 0.0 }
 0x196   :  { %v4521_v38 = vpop.f32.mrf.mxu1 }
 0x197   :  { %v1173_v41 = vmax.f32 %v855_v37, 0.0  ;;  %v870_v43 = vadd.f32 %v4521_v38, %v5593_v23 }
 0x198   :  { %v864_v44 = vpop.f32.mrf.mxu1 }
 0x199   :  { %v865_v45 = vadd.f32 %v5593_v23, %v864_v44  ;;  %4628 = vmatprep.mubr.msk.f32.mxu0 %vm1252_vm1, %v1173_v41  ;;  %v1176_v48 = vmax.f32 %v870_v43, 0.0 }
 0x19a   :  { %v4524_v46 = vpop.f32.mrf.mxu1  ;;  %4629 = vmatmul.mubr.msk.f32.vlgmr.msra.gmra.mxu0 %vm1252_vm1, %v1174_v42 }
 0x19b   :  { %v1175_v47 = vmax.f32 %v865_v45, 0.0  ;;  %v880_v49 = vadd.f32 %v4524_v46, %v5593_v23 }
 0x19c   :  { %v874_v50 = vpop.f32.mrf.mxu1 }
 0x19d   :  { %v875_v51 = vadd.f32 %v5593_v23, %v874_v50  ;;  %4631 = vmatprep.mubr.msk.f32.mxu0 %vm1252_vm1, %v1175_v47  ;;  %v1178_v54 = vmax.f32 %v880_v49, 0.0 }
 0x19e   :  { %v4527_v52 = vpop.f32.mrf.mxu1  ;;  %4632 = vmatmul.mubr.msk.f32.gmra.mxu0 %vm1252_vm1, %v1176_v48 }
 0x19f   :  { %v1177_v53 = vmax.f32 %v875_v51, 0.0  ;;  %v890_v55 = vadd.f32 %v4527_v52, %v5593_v23 }
 0x1a0   :  { %v884_v56 = vpop.f32.mrf.mxu1 }
 0x1a1   :  { %v885_v57 = vadd.f32 %v5593_v23, %v884_v56  ;;  %4634 = vmatprep.mubr.msk.f32.mxu0 %vm1252_vm1, %v1177_v53  ;;  %v1180_v60 = vmax.f32 %v890_v55, 0.0 }
 0x1a2   :  { %v4530_v58 = vpop.f32.mrf.mxu1  ;;  %4635 = vmatmul.mubr.msk.f32.gmra.mxu0 %vm1252_vm1, %v1178_v54 }
 0x1a3   :  { %v1179_v59 = vmax.f32 %v885_v57, 0.0  ;;  %v900_v61 = vadd.f32 %v4530_v58, %v5593_v23 }
 0x1a4   :  { %v894_v62 = vpop.f32.mrf.mxu1 }
 0x1a5   :  { %v895_v63 = vadd.f32 %v5593_v23, %v894_v62  ;;  %4637 = vmatprep.mubr.msk.f32.mxu0 %vm1252_vm1, %v1179_v59  ;;  %v1182_v2 = vmax.f32 %v900_v61, 0.0 }
 0x1a6   :  { %v4533_v0 = vpop.f32.mrf.mxu1  ;;  %4638 = vmatmul.mubr.msk.f32.gmra.mxu0 %vm1252_vm1, %v1180_v60 }
 0x1a7   :  { %v1181_v1 = vmax.f32 %v895_v63, 0.0  ;;  %v910_v3 = vadd.f32 %v4533_v0, %v5593_v23 }
 0x1a8   :  { %v904_v4 = vpop.f32.mrf.mxu1 }
 0x1a9   :  { %v905_v5 = vadd.f32 %v5593_v23, %v904_v4  ;;  %4640 = vmatprep.mubr.msk.f32.mxu0 %vm1252_vm1, %v1181_v1  ;;  %v1184_v8 = vmax.f32 %v910_v3, 0.0 }
 0x1aa   :  { %v4536_v6 = vpop.f32.mrf.mxu1  ;;  %4641 = vmatmul.mubr.msk.f32.gmra.mxu0 %vm1252_vm1, %v1182_v2 }
 0x1ab   :  { %v1183_v7 = vmax.f32 %v905_v5, 0.0  ;;  %v920_v9 = vadd.f32 %v4536_v6, %v5593_v23 }
 0x1ac   :  { %v914_v10 = vpop.f32.mrf.mxu1 }
 0x1ad   :  { %v915_v11 = vadd.f32 %v5593_v23, %v914_v10  ;;  %4643 = vmatprep.mubr.msk.f32.mxu0 %vm1252_vm1, %v1183_v7  ;;  %v1186_v14 = vmax.f32 %v920_v9, 0.0 }
 0x1ae   :  { %v4539_v12 = vpop.f32.mrf.mxu1  ;;  %4644 = vmatmul.mubr.msk.f32.gmra.mxu0 %vm1252_vm1, %v1184_v8 }
 0x1af   :  { %v1185_v13 = vmax.f32 %v915_v11, 0.0  ;;  %v930_v15 = vadd.f32 %v4539_v12, %v5593_v23 }
 0x1b0   :  { %v924_v16 = vpop.f32.mrf.mxu1 }
 0x1b1   :  { %v925_v17 = vadd.f32 %v5593_v23, %v924_v16  ;;  %4646 = vmatprep.mubr.msk.f32.mxu0 %vm1252_vm1, %v1185_v13  ;;  %v1188_v20 = vmax.f32 %v930_v15, 0.0 }
 0x1b2   :  { %v4542_v18 = vpop.f32.mrf.mxu1  ;;  %4647 = vmatmul.mubr.msk.f32.gmra.mxu0 %vm1252_vm1, %v1186_v14 }
 0x1b3   :  { %v1187_v19 = vmax.f32 %v925_v17, 0.0  ;;  %v940_v21 = vadd.f32 %v4542_v18, %v5593_v23 }
 0x1b4   :  { %v934_v22 = vpop.f32.mrf.mxu1 }
 0x1b5   :  { %v935_v24 = vadd.f32 %v5593_v23, %v934_v22  ;;  %4649 = vmatprep.mubr.msk.f32.mxu0 %vm1252_vm1, %v1187_v19  ;;  %v1190_v27 = vmax.f32 %v940_v21, 0.0 }
 0x1b6   :  { %v4545_v25 = vpop.f32.mrf.mxu1  ;;  %4650 = vmatmul.mubr.msk.f32.gmra.mxu0 %vm1252_vm1, %v1188_v20 }
 0x1b7   :  { %v1189_v26 = vmax.f32 %v935_v24, 0.0  ;;  %v950_v28 = vadd.f32 %v4545_v25, %v5593_v23 }
 0x1b8   :  { %v944_v29 = vpop.f32.mrf.mxu1 }
 0x1b9   :  { %v945_v30 = vadd.f32 %v5593_v23, %v944_v29  ;;  %4652 = vmatprep.mubr.msk.f32.mxu0 %vm1252_vm1, %v1189_v26  ;;  %v1192_v33 = vmax.f32 %v950_v28, 0.0 }
 0x1ba   :  { %v4548_v31 = vpop.f32.mrf.mxu1  ;;  %4653 = vmatmul.mubr.msk.f32.gmra.mxu0 %vm1252_vm1, %v1190_v27 }
 0x1bb   :  { %v1191_v32 = vmax.f32 %v945_v30, 0.0  ;;  %v960_v34 = vadd.f32 %v4548_v31, %v5593_v23 }
 0x1bc   :  { %v954_v35 = vpop.f32.mrf.mxu1 }
 0x1bd   :  { %v955_v36 = vadd.f32 %v5593_v23, %v954_v35  ;;  %4655 = vmatprep.mubr.msk.f32.mxu0 %vm1252_vm1, %v1191_v32  ;;  %v1194_v39 = vmax.f32 %v960_v34, 0.0 }
 0x1be   :  { %v4551_v37 = vpop.f32.mrf.mxu1  ;;  %4656 = vmatmul.mubr.msk.f32.gmra.mxu0 %vm1252_vm1, %v1192_v33 }
 0x1bf   :  { %v1193_v38 = vmax.f32 %v955_v36, 0.0  ;;  %v970_v40 = vadd.f32 %v4551_v37, %v5593_v23 }
 0x1c0   :  { %v964_v41 = vpop.f32.mrf.mxu1 }
 0x1c1   :  { %v965_v42 = vadd.f32 %v5593_v23, %v964_v41  ;;  %4658 = vmatprep.mubr.msk.f32.mxu0 %vm1252_vm1, %v1193_v38  ;;  %v1196_v45 = vmax.f32 %v970_v40, 0.0 }
 0x1c2   :  { %v4554_v43 = vpop.f32.mrf.mxu1  ;;  %4659 = vmatmul.mubr.msk.f32.gmra.mxu0 %vm1252_vm1, %v1194_v39 }
 0x1c3   :  { %v1195_v44 = vmax.f32 %v965_v42, 0.0  ;;  %v980_v46 = vadd.f32 %v4554_v43, %v5593_v23 }
 0x1c4   :  { %v974_v47 = vpop.f32.mrf.mxu1 }
 0x1c5   :  { %v975_v48 = vadd.f32 %v5593_v23, %v974_v47  ;;  %4661 = vmatprep.mubr.msk.f32.mxu0 %vm1252_vm1, %v1195_v44  ;;  %v1198_v51 = vmax.f32 %v980_v46, 0.0 }
 0x1c6   :  { %v4557_v49 = vpop.f32.mrf.mxu1  ;;  %4662 = vmatmul.mubr.msk.f32.gmra.mxu0 %vm1252_vm1, %v1196_v45 }
 0x1c7   :  { %v1197_v50 = vmax.f32 %v975_v48, 0.0  ;;  %v990_v52 = vadd.f32 %v4557_v49, %v5593_v23 }
 0x1c8   :  { %v984_v53 = vpop.f32.mrf.mxu1 }
 0x1c9   :  { %v985_v54 = vadd.f32 %v5593_v23, %v984_v53  ;;  %4664 = vmatprep.mubr.msk.f32.mxu0 %vm1252_vm1, %v1197_v50  ;;  %v1200_v57 = vmax.f32 %v990_v52, 0.0 }
 0x1ca   :  { %v4560_v55 = vpop.f32.mrf.mxu1  ;;  %4665 = vmatmul.mubr.msk.f32.gmra.mxu0 %vm1252_vm1, %v1198_v51 }
 0x1cb   :  { %v1199_v56 = vmax.f32 %v985_v54, 0.0  ;;  %v1000_v58 = vadd.f32 %v4560_v55, %v5593_v23 }
 0x1cc   :  { %v994_v59 = vpop.f32.mrf.mxu1 }
 0x1cd   :  { %v995_v60 = vadd.f32 %v5593_v23, %v994_v59  ;;  %4667 = vmatprep.mubr.msk.f32.mxu0 %vm1252_vm1, %v1199_v56  ;;  %v1202_v63 = vmax.f32 %v1000_v58, 0.0 }
 0x1ce   :  { %v4563_v61 = vpop.f32.mrf.mxu1  ;;  %4668 = vmatmul.mubr.msk.f32.gmra.mxu0 %vm1252_vm1, %v1200_v57 }
 0x1cf   :  { %v1201_v62 = vmax.f32 %v995_v60, 0.0  ;;  %v1010_v0 = vadd.f32 %v4563_v61, %v5593_v23 }
 0x1d0   :  { %v1004_v1 = vpop.f32.mrf.mxu1 }
 0x1d1   :  { %v1005_v2 = vadd.f32 %v5593_v23, %v1004_v1  ;;  %4670 = vmatprep.mubr.msk.f32.mxu0 %vm1252_vm1, %v1201_v62  ;;  %v1204_v5 = vmax.f32 %v1010_v0, 0.0 }
 0x1d2   :  { %v4566_v3 = vpop.f32.mrf.mxu1  ;;  %4671 = vmatmul.mubr.msk.f32.gmra.mxu0 %vm1252_vm1, %v1202_v63 }
 0x1d3   :  { %v1203_v4 = vmax.f32 %v1005_v2, 0.0  ;;  %v1020_v6 = vadd.f32 %v4566_v3, %v5593_v23 }
 0x1d4   :  { %v1014_v7 = vpop.f32.mrf.mxu1 }
 0x1d5   :  { %v1015_v8 = vadd.f32 %v5593_v23, %v1014_v7  ;;  %4673 = vmatprep.mubr.msk.f32.mxu0 %vm1252_vm1, %v1203_v4  ;;  %v1206_v11 = vmax.f32 %v1020_v6, 0.0 }
 0x1d6   :  { %v4569_v9 = vpop.f32.mrf.mxu1  ;;  %4674 = vmatmul.mubr.msk.f32.gmra.mxu0 %vm1252_vm1, %v1204_v5 }
 0x1d7   :  { %v1205_v10 = vmax.f32 %v1015_v8, 0.0  ;;  %v1030_v12 = vadd.f32 %v4569_v9, %v5593_v23 }
 0x1d8   :  { %v1024_v13 = vpop.f32.mrf.mxu1 }
 0x1d9   :  { %v1025_v14 = vadd.f32 %v5593_v23, %v1024_v13  ;;  %4676 = vmatprep.mubr.msk.f32.mxu0 %vm1252_vm1, %v1205_v10  ;;  %v1208_v17 = vmax.f32 %v1030_v12, 0.0 }
 0x1da   :  { %v4572_v15 = vpop.f32.mrf.mxu1  ;;  %4677 = vmatmul.mubr.msk.f32.gmra.mxu0 %vm1252_vm1, %v1206_v11 }
 0x1db   :  { %v1207_v16 = vmax.f32 %v1025_v14, 0.0  ;;  %v1040_v18 = vadd.f32 %v4572_v15, %v5593_v23 }
 0x1dc   :  { %v1034_v19 = vpop.f32.mrf.mxu1 }
 0x1dd   :  { %v1035_v20 = vadd.f32 %v5593_v23, %v1034_v19  ;;  %4679 = vmatprep.mubr.msk.f32.mxu0 %vm1252_vm1, %v1207_v16  ;;  %v1210_v24 = vmax.f32 %v1040_v18, 0.0 }
 0x1de   :  { %v4575_v21 = vpop.f32.mrf.mxu1  ;;  %4680 = vmatmul.mubr.msk.f32.gmra.mxu0 %vm1252_vm1, %v1208_v17 }
 0x1df   :  { %v1209_v22 = vmax.f32 %v1035_v20, 0.0  ;;  %v1050_v25 = vadd.f32 %v4575_v21, %v5593_v23 }
 0x1e0   :  { %v1044_v26 = vpop.f32.mrf.mxu1 }
 0x1e1   :  { %v1045_v27 = vadd.f32 %v5593_v23, %v1044_v26  ;;  %4682 = vmatprep.mubr.msk.f32.mxu0 %vm1252_vm1, %v1209_v22  ;;  %v1212_v30 = vmax.f32 %v1050_v25, 0.0 }
 0x1e2   :  { %v4578_v28 = vpop.f32.mrf.mxu1  ;;  %4683 = vmatmul.mubr.msk.f32.gmra.mxu0 %vm1252_vm1, %v1210_v24 }
 0x1e3   :  { %v1211_v29 = vmax.f32 %v1045_v27, 0.0  ;;  %v1060_v31 = vadd.f32 %v4578_v28, %v5593_v23 }
 0x1e4   :  { %v1054_v32 = vpop.f32.mrf.mxu1 }
 0x1e5   :  { %v1055_v33 = vadd.f32 %v5593_v23, %v1054_v32  ;;  %4685 = vmatprep.mubr.msk.f32.mxu0 %vm1252_vm1, %v1211_v29  ;;  %v1214_v36 = vmax.f32 %v1060_v31, 0.0 }
 0x1e6   :  { %v4581_v34 = vpop.f32.mrf.mxu1  ;;  %4686 = vmatmul.mubr.msk.f32.gmra.mxu0 %vm1252_vm1, %v1212_v30 }
 0x1e7   :  { %v1213_v35 = vmax.f32 %v1055_v33, 0.0  ;;  %v1070_v37 = vadd.f32 %v4581_v34, %v5593_v23 }
 0x1e8   :  { %v1064_v38 = vpop.f32.mrf.mxu1 }
 0x1e9   :  { %v1065_v39 = vadd.f32 %v5593_v23, %v1064_v38  ;;  %4688 = vmatprep.mubr.msk.f32.mxu0 %vm1252_vm1, %v1213_v35  ;;  %v1216_v42 = vmax.f32 %v1070_v37, 0.0 }
 0x1ea   :  { %v4584_v40 = vpop.f32.mrf.mxu1  ;;  %4689 = vmatmul.mubr.msk.f32.gmra.mxu0 %vm1252_vm1, %v1214_v36 }
 0x1eb   :  { %v1215_v41 = vmax.f32 %v1065_v39, 0.0  ;;  %v1080_v43 = vadd.f32 %v4584_v40, %v5593_v23  ;;  %v2553_v39 = vld [vmem:[%s6535_s10 + $0x38] sm:$0xff]  ;;  %v2551_v40 = vld [vmem:[%s6535_s10 + $0x28] sm:$0xff] }
 0x1ec   :  { %v1074_v44 = vpop.f32.mrf.mxu1  ;;  %4828 = vmatprep.subr.mxu0 %v2553_v39 }
 0x1ed   :  { %v1075_v45 = vadd.f32 %v5593_v23, %v1074_v44  ;;  %4691 = vmatprep.mubr.msk.f32.mxu0 %vm1252_vm1, %v1215_v41  ;;  %v1218_v48 = vmax.f32 %v1080_v43, 0.0  ;;  %4829 = vmatpush3.msra.mxu0 %v2553_v39  ;;  %v5741_v41 = vld [vmem:[%s6536_s7] ss:$0 sm:$0xff] }
 0x1ee   :  { %v4587_v46 = vpop.f32.mrf.mxu1  ;;  %4692 = vmatmul.mubr.msk.f32.gmra.mxu0 %vm1252_vm1, %v1216_v42  ;;  %v2550_v43 = vld [vmem:[%s6535_s10 + $0x20] sm:$0xff] }
 0x1ef   :  { %v1217_v47 = vmax.f32 %v1075_v45, 0.0  ;;  %v1090_v49 = vadd.f32 %v4587_v46, %v5593_v23 }
 0x1f0   :  { %v1084_v50 = vpop.f32.mrf.mxu1 }
 0x1f1   :  { %v1085_v51 = vadd.f32 %v5593_v23, %v1084_v50  ;;  %4694 = vmatprep.mubr.msk.f32.mxu0 %vm1252_vm1, %v1217_v47  ;;  %v1220_v54 = vmax.f32 %v1090_v49, 0.0  ;;  %v2548_v49 = vld [vmem:[%s6535_s10 + $0x10] sm:$0xff] }
 0x1f2   :  { %v4590_v52 = vpop.f32.mrf.mxu1  ;;  %4695 = vmatmul.mubr.msk.f32.gmra.mxu0 %vm1252_vm1, %v1218_v48  ;;  %v2549_v48 = vld [vmem:[%s6535_s10 + $0x18] sm:$0xff] }
 0x1f3   :  { %v1219_v53 = vmax.f32 %v1085_v51, 0.0  ;;  %v1100_v55 = vadd.f32 %v4590_v52, %v5593_v23 }
 0x1f4   :  { %v1094_v56 = vpop.f32.mrf.mxu1 }
 0x1f5   :  { %v1095_v57 = vadd.f32 %v5593_v23, %v1094_v56  ;;  %4697 = vmatprep.mubr.msk.f32.mxu0 %vm1252_vm1, %v1219_v53  ;;  %v1222_v60 = vmax.f32 %v1100_v55, 0.0 }
 0x1f6   :  { %v4593_v58 = vpop.f32.mrf.mxu1  ;;  %4698 = vmatmul.mubr.msk.f32.gmra.mxu0 %vm1252_vm1, %v1220_v54  ;;  %v2547_v54 = vld [vmem:[%s6535_s10 + $0x8] sm:$0xff] }
 0x1f7   :  { %v1221_v59 = vmax.f32 %v1095_v57, 0.0  ;;  %v1110_v61 = vadd.f32 %v4593_v58, %v5593_v23  ;;  %v2546_v57 = vld [vmem:[%s6535_s10] sm:$0xff] }
 0x1f8   :  { %v1104_v62 = vpop.f32.mrf.mxu1 }
 0x1f9   :  { %v1105_v63 = vadd.f32 %v5593_v23, %v1104_v62  ;;  %4700 = vmatprep.mubr.msk.f32.mxu0 %vm1252_vm1, %v1221_v59  ;;  %v1224_v2 = vmax.f32 %v1110_v61, 0.0 }
 0x1fa   :  { %v4596_v0 = vpop.f32.mrf.mxu1  ;;  %4701 = vmatmul.mubr.msk.f32.gmra.mxu0 %vm1252_vm1, %v1222_v60 }
 0x1fb   :  { %v1223_v1 = vmax.f32 %v1105_v63, 0.0  ;;  %v1120_v3 = vadd.f32 %v4596_v0, %v5593_v23 }
 0x1fc   :  { %v1114_v4 = vpop.f32.mrf.mxu1 }
 0x1fd   :  { %v1115_v5 = vadd.f32 %v5593_v23, %v1114_v4  ;;  %4703 = vmatprep.mubr.msk.f32.mxu0 %vm1252_vm1, %v1223_v1  ;;  %v1226_v8 = vmax.f32 %v1120_v3, 0.0 }
 0x1fe   :  { %v4599_v6 = vpop.f32.mrf.mxu1  ;;  %4704 = vmatmul.mubr.msk.f32.gmra.mxu0 %vm1252_vm1, %v1224_v2 }
 0x1ff   :  { %v1225_v7 = vmax.f32 %v1115_v5, 0.0  ;;  %v1130_v9 = vadd.f32 %v4599_v6, %v5593_v23 }
 0x200   :  { %v1124_v10 = vpop.f32.mrf.mxu1 }
 0x201   :  { %v1125_v11 = vadd.f32 %v5593_v23, %v1124_v10  ;;  %4706 = vmatprep.mubr.msk.f32.mxu0 %vm1252_vm1, %v1225_v7  ;;  %v1228_v14 = vmax.f32 %v1130_v9, 0.0 }
 0x202   :  { %v4602_v12 = vpop.f32.mrf.mxu1  ;;  %4707 = vmatmul.mubr.msk.f32.gmra.mxu0 %vm1252_vm1, %v1226_v8 }
 0x203   :  { %v1227_v13 = vmax.f32 %v1125_v11, 0.0  ;;  %v1140_v15 = vadd.f32 %v4602_v12, %v5593_v23 }
 0x204   :  { %v1134_v16 = vpop.f32.mrf.mxu1 }
 0x205   :  { %v1135_v17 = vadd.f32 %v5593_v23, %v1134_v16  ;;  %4709 = vmatprep.mubr.msk.f32.mxu0 %vm1252_vm1, %v1227_v13  ;;  %v1230_v20 = vmax.f32 %v1140_v15, 0.0 }
 0x206   :  { %v4605_v18 = vpop.f32.mrf.mxu1  ;;  %4710 = vmatmul.mubr.msk.f32.gmra.mxu0 %vm1252_vm1, %v1228_v14 }
 0x207   :  { %v1229_v19 = vmax.f32 %v1135_v17, 0.0  ;;  %v1150_v21 = vadd.f32 %v4605_v18, %v5593_v23 }
 0x208   :  { %v1144_v22 = vpop.f32.mrf.mxu1 }
 0x209   :  { %v1145_v24 = vadd.f32 %v5593_v23, %v1144_v22  ;;  %4712 = vmatprep.mubr.msk.f32.mxu0 %vm1252_vm1, %v1229_v19  ;;  %v1232_v27 = vmax.f32 %v1150_v21, 0.0 }
 0x20a   :  { %v4608_v25 = vpop.f32.mrf.mxu1  ;;  %4713 = vmatmul.mubr.msk.f32.gmra.mxu0 %vm1252_vm1, %v1230_v20 }
 0x20b   :  { %v1231_v26 = vmax.f32 %v1145_v24, 0.0  ;;  %v1160_v28 = vadd.f32 %v4608_v25, %v5593_v23 }
 0x20c   :  { %v1154_v29 = vpop.f32.mrf.mxu1 }
 0x20d   :  { %v1155_v30 = vadd.f32 %v5593_v23, %v1154_v29  ;;  %4715 = vmatprep.mubr.msk.f32.mxu0 %vm1252_vm1, %v1231_v26  ;;  %v1234_v33 = vmax.f32 %v1160_v28, 0.0 }
 0x20e   :  { %v4611_v31 = vpop.f32.mrf.mxu1  ;;  %4716 = vmatmul.mubr.msk.f32.gmra.mxu0 %vm1252_vm1, %v1232_v27 }
 0x20f   :  { %v1233_v32 = vmax.f32 %v1155_v30, 0.0  ;;  %v1170_v34 = vadd.f32 %v4611_v31, %v5593_v23 }
 0x210   :  { %v1164_v35 = vpop.f32.mrf.mxu1 }
 0x211   :  { %v1165_v36 = vadd.f32 %v5593_v23, %v1164_v35  ;;  %4718 = vmatprep.mubr.msk.f32.mxu0 %vm1252_vm1, %v1233_v32  ;;  %v1236_v38 = vmax.f32 %v1170_v34, 0.0  ;;  %v2552_v23 = vld [vmem:[%s6535_s10 + $0x30] sm:$0xff] }
 0x212   :  { %4719 = vmatmul.mubr.msk.f32.gmra.mxu0 %vm1252_vm1, %v1234_v33  ;;  %4830 = vmatprep.subr.mxu0 %v2552_v23 }
 0x213   :  { %v1235_v37 = vmax.f32 %v1165_v36, 0.0  ;;  %4831 = vmatpush3.msra.mxu0 %v2552_v23 }
 0x214   :  { %4832 = vmatprep.subr.mxu0 %v2551_v40 }
 0x215   :  { %4721 = vmatprep.mubr.msk.f32.mxu0 %vm1252_vm1, %v1235_v37  ;;  %4833 = vmatpush3.msra.mxu0 %v2551_v40 }
 0x216   :  { %4722 = vmatmul.mubr.msk.f32.gmra.mxu0 %vm1252_vm1, %v1236_v38  ;;  %4834 = vmatprep.subr.mxu0 %v2550_v43 }
 0x217   :  { %4835 = vmatpush3.msra.mxu0 %v2550_v43 }
 0x218   :  { %4836 = vmatprep.subr.mxu0 %v2549_v48 }
 0x219   :  { %4837 = vmatpush3.msra.mxu0 %v2549_v48 }
 0x21a   :  { %4838 = vmatprep.subr.mxu0 %v2548_v49 }
 0x21b   :  { %4839 = vmatpush3.msra.mxu0 %v2548_v49 }
 0x21c   :  { %4840 = vmatprep.subr.mxu0 %v2547_v54 }
 0x21d   :  { %4841 = vmatpush3.msra.mxu0 %v2547_v54 }
 0x21e   :  { %4842 = vmatprep.subr.mxu0 %v2546_v57 }
 0x21f   :  { %4843 = vmatpush3.msra.mxu0 %v2546_v57 }
 0x25a   :  { %v4630_v42 = vpop.f32.mrf.mxu0 }
 0x25b   :  { %v1517_v44 = vadd.f32 %v4630_v42, %v5741_v41 }
 0x25c   :  { %v1511_v45 = vpop.f32.mrf.mxu0 }
 0x25d   :  { %v1512_v46 = vadd.f32 %v5741_v41, %v1511_v45  ;;  %v1831_v51 = vmax.f32 %v1517_v44, 0.0 }
 0x25e   :  { %v4633_v47 = vpop.f32.mrf.mxu0 }
 0x25f   :  { %v1830_v50 = vmax.f32 %v1512_v46, 0.0  ;;  %v1527_v52 = vadd.f32 %v4633_v47, %v5741_v41 }
 0x260   :  { %v1521_v53 = vpop.f32.mrf.mxu0 }
 0x261   :  { %v1522_v55 = vadd.f32 %v5741_v41, %v1521_v53  ;;  %4732 = vmatprep.mubr.msk.f32.mxu1 %vm123_vm0, %v1830_v50  ;;  %v1833_v59 = vmax.f32 %v1527_v52, 0.0 }
 0x262   :  { %v4636_v56 = vpop.f32.mrf.mxu0  ;;  %4733 = vmatmul.mubr.msk.f32.vlgmr.msra.gmra.mxu1 %vm123_vm0, %v1831_v51 }
 0x263   :  { %v1832_v58 = vmax.f32 %v1522_v55, 0.0  ;;  %v1537_v60 = vadd.f32 %v4636_v56, %v5741_v41 }
 0x264   :  { %v1531_v61 = vpop.f32.mrf.mxu0 }
 0x265   :  { %v1532_v62 = vadd.f32 %v5741_v41, %v1531_v61  ;;  %4735 = vmatprep.mubr.msk.f32.mxu1 %vm123_vm0, %v1832_v58  ;;  %v1835_v1 = vmax.f32 %v1537_v60, 0.0 }
 0x266   :  { %v4639_v63 = vpop.f32.mrf.mxu0  ;;  %4736 = vmatmul.mubr.msk.f32.gmra.mxu1 %vm123_vm0, %v1833_v59 }
 0x267   :  { %v1834_v0 = vmax.f32 %v1532_v62, 0.0  ;;  %v1547_v2 = vadd.f32 %v4639_v63, %v5741_v41 }
 0x268   :  { %v1541_v3 = vpop.f32.mrf.mxu0 }
 0x269   :  { %v1542_v4 = vadd.f32 %v5741_v41, %v1541_v3  ;;  %4738 = vmatprep.mubr.msk.f32.mxu1 %vm123_vm0, %v1834_v0  ;;  %v1837_v7 = vmax.f32 %v1547_v2, 0.0 }
 0x26a   :  { %v4642_v5 = vpop.f32.mrf.mxu0  ;;  %4739 = vmatmul.mubr.msk.f32.gmra.mxu1 %vm123_vm0, %v1835_v1 }
 0x26b   :  { %v1836_v6 = vmax.f32 %v1542_v4, 0.0  ;;  %v1557_v8 = vadd.f32 %v4642_v5, %v5741_v41 }
 0x26c   :  { %v1551_v9 = vpop.f32.mrf.mxu0 }
 0x26d   :  { %v1552_v10 = vadd.f32 %v5741_v41, %v1551_v9  ;;  %4741 = vmatprep.mubr.msk.f32.mxu1 %vm123_vm0, %v1836_v6  ;;  %v1839_v13 = vmax.f32 %v1557_v8, 0.0 }
 0x26e   :  { %v4645_v11 = vpop.f32.mrf.mxu0  ;;  %4742 = vmatmul.mubr.msk.f32.gmra.mxu1 %vm123_vm0, %v1837_v7 }
 0x26f   :  { %v1838_v12 = vmax.f32 %v1552_v10, 0.0  ;;  %v1567_v14 = vadd.f32 %v4645_v11, %v5741_v41 }
 0x270   :  { %v1561_v15 = vpop.f32.mrf.mxu0 }
 0x271   :  { %v1562_v16 = vadd.f32 %v5741_v41, %v1561_v15  ;;  %4744 = vmatprep.mubr.msk.f32.mxu1 %vm123_vm0, %v1838_v12  ;;  %v1841_v19 = vmax.f32 %v1567_v14, 0.0 }
 0x272   :  { %v4648_v17 = vpop.f32.mrf.mxu0  ;;  %4745 = vmatmul.mubr.msk.f32.gmra.mxu1 %vm123_vm0, %v1839_v13 }
 0x273   :  { %v1840_v18 = vmax.f32 %v1562_v16, 0.0  ;;  %v1577_v20 = vadd.f32 %v4648_v17, %v5741_v41 }
 0x274   :  { %v1571_v21 = vpop.f32.mrf.mxu0 }
 0x275   :  { %v1572_v22 = vadd.f32 %v5741_v41, %v1571_v21  ;;  %4747 = vmatprep.mubr.msk.f32.mxu1 %vm123_vm0, %v1840_v18  ;;  %v1843_v26 = vmax.f32 %v1577_v20, 0.0 }
 0x276   :  { %v4651_v24 = vpop.f32.mrf.mxu0  ;;  %4748 = vmatmul.mubr.msk.f32.gmra.mxu1 %vm123_vm0, %v1841_v19 }
 0x277   :  { %v1842_v25 = vmax.f32 %v1572_v22, 0.0  ;;  %v1587_v27 = vadd.f32 %v4651_v24, %v5741_v41 }
 0x278   :  { %v1581_v28 = vpop.f32.mrf.mxu0 }
 0x279   :  { %v1582_v29 = vadd.f32 %v5741_v41, %v1581_v28  ;;  %4750 = vmatprep.mubr.msk.f32.mxu1 %vm123_vm0, %v1842_v25  ;;  %v1845_v32 = vmax.f32 %v1587_v27, 0.0 }
 0x27a   :  { %v4654_v30 = vpop.f32.mrf.mxu0  ;;  %4751 = vmatmul.mubr.msk.f32.gmra.mxu1 %vm123_vm0, %v1843_v26 }
 0x27b   :  { %v1844_v31 = vmax.f32 %v1582_v29, 0.0  ;;  %v1597_v33 = vadd.f32 %v4654_v30, %v5741_v41 }
 0x27c   :  { %v1591_v34 = vpop.f32.mrf.mxu0 }
 0x27d   :  { %v1592_v35 = vadd.f32 %v5741_v41, %v1591_v34  ;;  %4753 = vmatprep.mubr.msk.f32.mxu1 %vm123_vm0, %v1844_v31  ;;  %v1847_v38 = vmax.f32 %v1597_v33, 0.0 }
 0x27e   :  { %v4657_v36 = vpop.f32.mrf.mxu0  ;;  %4754 = vmatmul.mubr.msk.f32.gmra.mxu1 %vm123_vm0, %v1845_v32 }
 0x27f   :  { %v1846_v37 = vmax.f32 %v1592_v35, 0.0  ;;  %v1607_v39 = vadd.f32 %v4657_v36, %v5741_v41 }
 0x280   :  { %v1601_v23 = vpop.f32.mrf.mxu0 }
 0x281   :  { %v1602_v40 = vadd.f32 %v5741_v41, %v1601_v23  ;;  %4756 = vmatprep.mubr.msk.f32.mxu1 %vm123_vm0, %v1846_v37  ;;  %v1849_v44 = vmax.f32 %v1607_v39, 0.0 }
 0x282   :  { %v4660_v42 = vpop.f32.mrf.mxu0  ;;  %4757 = vmatmul.mubr.msk.f32.gmra.mxu1 %vm123_vm0, %v1847_v38 }
 0x283   :  { %v1848_v43 = vmax.f32 %v1602_v40, 0.0  ;;  %v1617_v45 = vadd.f32 %v4660_v42, %v5741_v41 }
 0x284   :  { %v1611_v46 = vpop.f32.mrf.mxu0 }
 0x285   :  { %v1612_v47 = vadd.f32 %v5741_v41, %v1611_v46  ;;  %4759 = vmatprep.mubr.msk.f32.mxu1 %vm123_vm0, %v1848_v43  ;;  %v1851_v50 = vmax.f32 %v1617_v45, 0.0 }
 0x286   :  { %v4663_v48 = vpop.f32.mrf.mxu0  ;;  %4760 = vmatmul.mubr.msk.f32.gmra.mxu1 %vm123_vm0, %v1849_v44 }
 0x287   :  { %v1850_v49 = vmax.f32 %v1612_v47, 0.0  ;;  %v1627_v51 = vadd.f32 %v4663_v48, %v5741_v41 }
 0x288   :  { %v1621_v52 = vpop.f32.mrf.mxu0 }
 0x289   :  { %v1622_v53 = vadd.f32 %v5741_v41, %v1621_v52  ;;  %4762 = vmatprep.mubr.msk.f32.mxu1 %vm123_vm0, %v1850_v49  ;;  %v1853_v56 = vmax.f32 %v1627_v51, 0.0 }
 0x28a   :  { %v4666_v54 = vpop.f32.mrf.mxu0  ;;  %4763 = vmatmul.mubr.msk.f32.gmra.mxu1 %vm123_vm0, %v1851_v50 }
 0x28b   :  { %v1852_v55 = vmax.f32 %v1622_v53, 0.0  ;;  %v1637_v57 = vadd.f32 %v4666_v54, %v5741_v41 }
 0x28c   :  { %v1631_v58 = vpop.f32.mrf.mxu0 }
 0x28d   :  { %v1632_v59 = vadd.f32 %v5741_v41, %v1631_v58  ;;  %4765 = vmatprep.mubr.msk.f32.mxu1 %vm123_vm0, %v1852_v55  ;;  %v1855_v62 = vmax.f32 %v1637_v57, 0.0 }
 0x28e   :  { %v4669_v60 = vpop.f32.mrf.mxu0  ;;  %4766 = vmatmul.mubr.msk.f32.gmra.mxu1 %vm123_vm0, %v1853_v56 }
 0x28f   :  { %v1854_v61 = vmax.f32 %v1632_v59, 0.0  ;;  %v1647_v63 = vadd.f32 %v4669_v60, %v5741_v41 }
 0x290   :  { %v1641_v0 = vpop.f32.mrf.mxu0 }
 0x291   :  { %v1642_v1 = vadd.f32 %v5741_v41, %v1641_v0  ;;  %4768 = vmatprep.mubr.msk.f32.mxu1 %vm123_vm0, %v1854_v61  ;;  %v1857_v4 = vmax.f32 %v1647_v63, 0.0 }
 0x292   :  { %v4672_v2 = vpop.f32.mrf.mxu0  ;;  %4769 = vmatmul.mubr.msk.f32.gmra.mxu1 %vm123_vm0, %v1855_v62 }
 0x293   :  { %v1856_v3 = vmax.f32 %v1642_v1, 0.0  ;;  %v1657_v5 = vadd.f32 %v4672_v2, %v5741_v41 }
 0x294   :  { %v1651_v6 = vpop.f32.mrf.mxu0 }
 0x295   :  { %v1652_v7 = vadd.f32 %v5741_v41, %v1651_v6  ;;  %4771 = vmatprep.mubr.msk.f32.mxu1 %vm123_vm0, %v1856_v3  ;;  %v1859_v10 = vmax.f32 %v1657_v5, 0.0 }
 0x296   :  { %v4675_v8 = vpop.f32.mrf.mxu0  ;;  %4772 = vmatmul.mubr.msk.f32.gmra.mxu1 %vm123_vm0, %v1857_v4 }
 0x297   :  { %v1858_v9 = vmax.f32 %v1652_v7, 0.0  ;;  %v1667_v11 = vadd.f32 %v4675_v8, %v5741_v41 }
 0x298   :  { %v1661_v12 = vpop.f32.mrf.mxu0 }
 0x299   :  { %v1662_v13 = vadd.f32 %v5741_v41, %v1661_v12  ;;  %4774 = vmatprep.mubr.msk.f32.mxu1 %vm123_vm0, %v1858_v9  ;;  %v1861_v16 = vmax.f32 %v1667_v11, 0.0 }
 0x29a   :  { %v4678_v14 = vpop.f32.mrf.mxu0  ;;  %4775 = vmatmul.mubr.msk.f32.gmra.mxu1 %vm123_vm0, %v1859_v10 }
 0x29b   :  { %v1860_v15 = vmax.f32 %v1662_v13, 0.0  ;;  %v1677_v17 = vadd.f32 %v4678_v14, %v5741_v41 }
 0x29c   :  { %v1671_v18 = vpop.f32.mrf.mxu0 }
 0x29d   :  { %v1672_v19 = vadd.f32 %v5741_v41, %v1671_v18  ;;  %4777 = vmatprep.mubr.msk.f32.mxu1 %vm123_vm0, %v1860_v15  ;;  %v1863_v22 = vmax.f32 %v1677_v17, 0.0 }
 0x29e   :  { %v4681_v20 = vpop.f32.mrf.mxu0  ;;  %4778 = vmatmul.mubr.msk.f32.gmra.mxu1 %vm123_vm0, %v1861_v16 }
 0x29f   :  { %v1862_v21 = vmax.f32 %v1672_v19, 0.0  ;;  %v1687_v24 = vadd.f32 %v4681_v20, %v5741_v41 }
 0x2a0   :  { %v1681_v25 = vpop.f32.mrf.mxu0 }
 0x2a1   :  { %v1682_v26 = vadd.f32 %v5741_v41, %v1681_v25  ;;  %4780 = vmatprep.mubr.msk.f32.mxu1 %vm123_vm0, %v1862_v21  ;;  %v1865_v29 = vmax.f32 %v1687_v24, 0.0 }
 0x2a2   :  { %v4684_v27 = vpop.f32.mrf.mxu0  ;;  %4781 = vmatmul.mubr.msk.f32.gmra.mxu1 %vm123_vm0, %v1863_v22 }
 0x2a3   :  { %v1864_v28 = vmax.f32 %v1682_v26, 0.0  ;;  %v1697_v30 = vadd.f32 %v4684_v27, %v5741_v41 }
 0x2a4   :  { %v1691_v31 = vpop.f32.mrf.mxu0 }
 0x2a5   :  { %v1692_v32 = vadd.f32 %v5741_v41, %v1691_v31  ;;  %4783 = vmatprep.mubr.msk.f32.mxu1 %vm123_vm0, %v1864_v28  ;;  %v1867_v35 = vmax.f32 %v1697_v30, 0.0 }
 0x2a6   :  { %v4687_v33 = vpop.f32.mrf.mxu0  ;;  %4784 = vmatmul.mubr.msk.f32.gmra.mxu1 %vm123_vm0, %v1865_v29 }
 0x2a7   :  { %v1866_v34 = vmax.f32 %v1692_v32, 0.0  ;;  %v1707_v36 = vadd.f32 %v4687_v33, %v5741_v41 }
 0x2a8   :  { %v1701_v37 = vpop.f32.mrf.mxu0 }
 0x2a9   :  { %v1702_v38 = vadd.f32 %v5741_v41, %v1701_v37  ;;  %4786 = vmatprep.mubr.msk.f32.mxu1 %vm123_vm0, %v1866_v34  ;;  %v1869_v40 = vmax.f32 %v1707_v36, 0.0 }
 0x2aa   :  { %v4690_v39 = vpop.f32.mrf.mxu0  ;;  %4787 = vmatmul.mubr.msk.f32.gmra.mxu1 %vm123_vm0, %v1867_v35 }
 0x2ab   :  { %v1868_v23 = vmax.f32 %v1702_v38, 0.0  ;;  %v1717_v42 = vadd.f32 %v4690_v39, %v5741_v41 }
 0x2ac   :  { %v1711_v43 = vpop.f32.mrf.mxu0 }
 0x2ad   :  { %v1712_v44 = vadd.f32 %v5741_v41, %v1711_v43  ;;  %4789 = vmatprep.mubr.msk.f32.mxu1 %vm123_vm0, %v1868_v23  ;;  %v1871_v47 = vmax.f32 %v1717_v42, 0.0 }
 0x2ae   :  { %v4693_v45 = vpop.f32.mrf.mxu0  ;;  %4790 = vmatmul.mubr.msk.f32.gmra.mxu1 %vm123_vm0, %v1869_v40 }
 0x2af   :  { %v1870_v46 = vmax.f32 %v1712_v44, 0.0  ;;  %v1727_v48 = vadd.f32 %v4693_v45, %v5741_v41 }
 0x2b0   :  { %v1721_v49 = vpop.f32.mrf.mxu0 }
 0x2b1   :  { %v1722_v50 = vadd.f32 %v5741_v41, %v1721_v49  ;;  %4792 = vmatprep.mubr.msk.f32.mxu1 %vm123_vm0, %v1870_v46  ;;  %v1873_v53 = vmax.f32 %v1727_v48, 0.0 }
 0x2b2   :  { %v4696_v51 = vpop.f32.mrf.mxu0  ;;  %4793 = vmatmul.mubr.msk.f32.gmra.mxu1 %vm123_vm0, %v1871_v47 }
 0x2b3   :  { %v1872_v52 = vmax.f32 %v1722_v50, 0.0  ;;  %v1737_v54 = vadd.f32 %v4696_v51, %v5741_v41  ;;  %v3217_v50 = vld [vmem:[%s6537_s12 + $0x78] sm:$0xff]  ;;  %v5895_v51 = vld [vmem:[%s6537_s12 + $0x68] sm:$0xff] }
 0x2b4   :  { %v1731_v55 = vpop.f32.mrf.mxu0  ;;  %5068 = vmatprep.subr.mxu1 %v3217_v50  ;;  %4940 = vmatprep.subr.mxu0 %v3217_v50 }
 0x2b5   :  { %v1732_v56 = vadd.f32 %v5741_v41, %v1731_v55  ;;  %4795 = vmatprep.mubr.msk.f32.mxu1 %vm123_vm0, %v1872_v52  ;;  %v1875_v59 = vmax.f32 %v1737_v54, 0.0  ;;  %5084 = vmatpush3.msra.mxu1 %v3217_v50  ;;  %v5902_v52 = vld [vmem:[%s6537_s12 + $0x60] sm:$0xff] }
 0x2b6   :  { %v4699_v57 = vpop.f32.mrf.mxu0  ;;  %4796 = vmatmul.mubr.msk.f32.gmra.mxu1 %vm123_vm0, %v1873_v53  ;;  %v5909_v53 = vld [vmem:[%s6537_s12 + $0x58] sm:$0xff]  ;;  %v5915_v54 = vld [vmem:[%s6538_s9] ss:$0 sm:$0xff] }
 0x2b7   :  { %v1874_v58 = vmax.f32 %v1732_v56, 0.0  ;;  %v1747_v60 = vadd.f32 %v4699_v57, %v5741_v41 }
 0x2b8   :  { %v1741_v61 = vpop.f32.mrf.mxu0 }
 0x2b9   :  { %v1742_v62 = vadd.f32 %v5741_v41, %v1741_v61  ;;  %4798 = vmatprep.mubr.msk.f32.mxu1 %vm123_vm0, %v1874_v58  ;;  %v1877_v1 = vmax.f32 %v1747_v60, 0.0 }
 0x2ba   :  { %v4702_v63 = vpop.f32.mrf.mxu0  ;;  %4799 = vmatmul.mubr.msk.f32.gmra.mxu1 %vm123_vm0, %v1875_v59  ;;  %v5923_v59 = vld [vmem:[%s6537_s12 + $0x50] sm:$0xff] }
 0x2bb   :  { %v1876_v0 = vmax.f32 %v1742_v62, 0.0  ;;  %v1757_v2 = vadd.f32 %v4702_v63, %v5741_v41  ;;  %v5930_v62 = vld [vmem:[%s6537_s12 + $0x48] sm:$0xff] }
 0x2bc   :  { %v1751_v3 = vpop.f32.mrf.mxu0 }
 0x2bd   :  { %v1752_v4 = vadd.f32 %v5741_v41, %v1751_v3  ;;  %4801 = vmatprep.mubr.msk.f32.mxu1 %vm123_vm0, %v1876_v0  ;;  %v1879_v7 = vmax.f32 %v1757_v2, 0.0  ;;  %v5940_v3 = vld [vmem:[%s6537_s12 + $0x40] sm:$0xff] }
 0x2be   :  { %v4705_v5 = vpop.f32.mrf.mxu0  ;;  %4802 = vmatmul.mubr.msk.f32.gmra.mxu1 %vm123_vm0, %v1877_v1 }
 0x2bf   :  { %v1878_v6 = vmax.f32 %v1752_v4, 0.0  ;;  %v1767_v8 = vadd.f32 %v4705_v5, %v5741_v41 }
 0x2c0   :  { %v1761_v9 = vpop.f32.mrf.mxu0 }
 0x2c1   :  { %v1762_v10 = vadd.f32 %v5741_v41, %v1761_v9  ;;  %4804 = vmatprep.mubr.msk.f32.mxu1 %vm123_vm0, %v1878_v6  ;;  %v1881_v13 = vmax.f32 %v1767_v8, 0.0  ;;  %v5948_v6 = vld [vmem:[%s6537_s12 + $0x38] sm:$0xff] }
 0x2c2   :  { %v4708_v11 = vpop.f32.mrf.mxu0  ;;  %4805 = vmatmul.mubr.msk.f32.gmra.mxu1 %vm123_vm0, %v1879_v7 }
 0x2c3   :  { %v1880_v12 = vmax.f32 %v1762_v10, 0.0  ;;  %v1777_v14 = vadd.f32 %v4708_v11, %v5741_v41  ;;  %v5958_v11 = vld [vmem:[%s6537_s12 + $0x30] sm:$0xff] }
 0x2c4   :  { %v1771_v15 = vpop.f32.mrf.mxu0 }
 0x2c5   :  { %v1772_v16 = vadd.f32 %v5741_v41, %v1771_v15  ;;  %4807 = vmatprep.mubr.msk.f32.mxu1 %vm123_vm0, %v1880_v12  ;;  %v1883_v19 = vmax.f32 %v1777_v14, 0.0  ;;  %v5966_v14 = vld [vmem:[%s6537_s12 + $0x28] sm:$0xff] }
 0x2c6   :  { %v4711_v17 = vpop.f32.mrf.mxu0  ;;  %4808 = vmatmul.mubr.msk.f32.gmra.mxu1 %vm123_vm0, %v1881_v13 }
 0x2c7   :  { %v1882_v18 = vmax.f32 %v1772_v16, 0.0  ;;  %v1787_v20 = vadd.f32 %v4711_v17, %v5741_v41 }
 0x2c8   :  { %v1781_v21 = vpop.f32.mrf.mxu0 }
 0x2c9   :  { %v1782_v22 = vadd.f32 %v5741_v41, %v1781_v21  ;;  %4810 = vmatprep.mubr.msk.f32.mxu1 %vm123_vm0, %v1882_v18  ;;  %v1885_v26 = vmax.f32 %v1787_v20, 0.0 }
 0x2ca   :  { %v4714_v24 = vpop.f32.mrf.mxu0  ;;  %4811 = vmatmul.mubr.msk.f32.gmra.mxu1 %vm123_vm0, %v1883_v19  ;;  %v5977_v19 = vld [vmem:[%s6537_s12 + $0x20] sm:$0xff] }
 0x2cb   :  { %v1884_v25 = vmax.f32 %v1782_v22, 0.0  ;;  %v1797_v27 = vadd.f32 %v4714_v24, %v5741_v41  ;;  %v5986_v22 = vld [vmem:[%s6537_s12 + $0x18] sm:$0xff] }
 0x2cc   :  { %v1791_v28 = vpop.f32.mrf.mxu0 }
 0x2cd   :  { %v1792_v29 = vadd.f32 %v5741_v41, %v1791_v28  ;;  %4813 = vmatprep.mubr.msk.f32.mxu1 %vm123_vm0, %v1884_v25  ;;  %v1887_v32 = vmax.f32 %v1797_v27, 0.0 }
 0x2ce   :  { %v4717_v30 = vpop.f32.mrf.mxu0  ;;  %4814 = vmatmul.mubr.msk.f32.gmra.mxu1 %vm123_vm0, %v1885_v26 }
 0x2cf   :  { %v1886_v31 = vmax.f32 %v1792_v29, 0.0  ;;  %v1807_v33 = vadd.f32 %v4717_v30, %v5741_v41  ;;  %v3204_v30 = vld [vmem:[%s6537_s12 + $0x10] sm:$0xff] }
 0x2d0   :  { %v1801_v34 = vpop.f32.mrf.mxu0 }
 0x2d1   :  { %v1802_v35 = vadd.f32 %v5741_v41, %v1801_v34  ;;  %4816 = vmatprep.mubr.msk.f32.mxu1 %vm123_vm0, %v1886_v31  ;;  %v1889_v38 = vmax.f32 %v1807_v33, 0.0 }
 0x2d2   :  { %v4720_v36 = vpop.f32.mrf.mxu0  ;;  %4817 = vmatmul.mubr.msk.f32.gmra.mxu1 %vm123_vm0, %v1887_v32 }
 0x2d3   :  { %v1888_v37 = vmax.f32 %v1802_v35, 0.0  ;;  %v1817_v39 = vadd.f32 %v4720_v36, %v5741_v41 }
 0x2d4   :  { %v1811_v23 = vpop.f32.mrf.mxu0 }
 0x2d5   :  { %v1812_v40 = vadd.f32 %v5741_v41, %v1811_v23  ;;  %4819 = vmatprep.mubr.msk.f32.mxu1 %vm123_vm0, %v1888_v37  ;;  %v1891_v44 = vmax.f32 %v1817_v39, 0.0 }
 0x2d6   :  { %v4723_v42 = vpop.f32.mrf.mxu0  ;;  %4820 = vmatmul.mubr.msk.f32.gmra.mxu1 %vm123_vm0, %v1889_v38 }
 0x2d7   :  { %v1890_v43 = vmax.f32 %v1812_v40, 0.0  ;;  %v1827_v45 = vadd.f32 %v4723_v42, %v5741_v41 }
 0x2d8   :  { %v1821_v46 = vpop.f32.mrf.mxu0 }
 0x2d9   :  { %v1822_v47 = vadd.f32 %v5741_v41, %v1821_v46  ;;  %4822 = vmatprep.mubr.msk.f32.mxu1 %vm123_vm0, %v1890_v43  ;;  %v1893_v49 = vmax.f32 %v1827_v45, 0.0  ;;  %v3216_v41 = vld [vmem:[%s6537_s12 + $0x70] sm:$0xff] }
 0x2da   :  { %4823 = vmatmul.mubr.msk.f32.gmra.mxu1 %vm123_vm0, %v1891_v44  ;;  %5069 = vmatprep.subr.mxu1 %v3216_v41 }
 0x2db   :  { %v1892_v48 = vmax.f32 %v1822_v47, 0.0  ;;  %5085 = vmatpush3.msra.mxu1 %v3216_v41 }
 0x2dc   :  { %5070 = vmatprep.subr.mxu1 %v5895_v51 }
 0x2dd   :  { %4825 = vmatprep.mubr.msk.f32.mxu1 %vm123_vm0, %v1892_v48  ;;  %5086 = vmatpush3.msra.mxu1 %v5895_v51 }
 0x2de   :  { %4826 = vmatmul.mubr.msk.f32.gmra.mxu1 %vm123_vm0, %v1893_v49  ;;  %5071 = vmatprep.subr.mxu1 %v5902_v52 }
 0x2df   :  { %5087 = vmatpush3.msra.mxu1 %v5902_v52 }
 0x2e0   :  { %5072 = vmatprep.subr.mxu1 %v5909_v53 }
 0x2e1   :  { %5088 = vmatpush3.msra.mxu1 %v5909_v53 }
 0x2e2   :  { %5073 = vmatprep.subr.mxu1 %v5923_v59 }
 0x2e3   :  { %5089 = vmatpush3.msra.mxu1 %v5923_v59 }
 0x2e4   :  { %5074 = vmatprep.subr.mxu1 %v5930_v62 }
 0x2e5   :  { %5090 = vmatpush3.msra.mxu1 %v5930_v62 }
 0x2e6   :  { %5075 = vmatprep.subr.mxu1 %v5940_v3 }
 0x2e7   :  { %5091 = vmatpush3.msra.mxu1 %v5940_v3 }
 0x2e8   :  { %5076 = vmatprep.subr.mxu1 %v5948_v6 }
 0x2e9   :  { %5092 = vmatpush3.msra.mxu1 %v5948_v6 }
 0x2ea   :  { %5077 = vmatprep.subr.mxu1 %v5958_v11 }
 0x2eb   :  { %5093 = vmatpush3.msra.mxu1 %v5958_v11 }
 0x2ec   :  { %5078 = vmatprep.subr.mxu1 %v5966_v14 }
 0x2ed   :  { %5094 = vmatpush3.msra.mxu1 %v5966_v14 }
 0x2ee   :  { %5079 = vmatprep.subr.mxu1 %v5977_v19 }
 0x2ef   :  { %5095 = vmatpush3.msra.mxu1 %v5977_v19 }
 0x2f0   :  { %5080 = vmatprep.subr.mxu1 %v5986_v22 }
 0x2f1   :  { %5096 = vmatpush3.msra.mxu1 %v5986_v22 }
 0x2f2   :  { %5081 = vmatprep.subr.mxu1 %v3204_v30 }
 0x2f3   :  { %5097 = vmatpush3.msra.mxu1 %v3204_v30 }
 0x322   :  { %v4734_v55 = vpop.f32.mrf.mxu1 }
 0x323   :  { %v2169_v56 = vadd.f32 %v4734_v55, %v5915_v54 }
 0x324   :  { %v2163_v57 = vpop.f32.mrf.mxu1 }
 0x325   :  { %v2164_v58 = vadd.f32 %v5915_v54, %v2163_v57  ;;  %v2483_v63 = vmax.f32 %v2169_v56, 0.0 }
 0x326   :  { %v4737_v60 = vpop.f32.mrf.mxu1 }
 0x327   :  { %v2482_v61 = vmax.f32 %v2164_v58, 0.0  ;;  %v2179_v0 = vadd.f32 %v4737_v60, %v5915_v54 }
 0x328   :  { %v2173_v1 = vpop.f32.mrf.mxu1 }
 0x329   :  { %v2174_v2 = vadd.f32 %v5915_v54, %v2173_v1  ;;  %4844 = vmatprep.mubr.msk.f32.mxu0 %vm1252_vm1, %v2482_v61  ;;  %v2485_v7 = vmax.f32 %v2179_v0, 0.0 }
 0x32a   :  { %v4740_v4 = vpop.f32.mrf.mxu1  ;;  %4845 = vmatmul.mubr.msk.f32.vlgmr.msra.gmra.mxu0 %vm1252_vm1, %v2483_v63 }
 0x32b   :  { %v2484_v5 = vmax.f32 %v2174_v2, 0.0  ;;  %4941 = vmatpush3.msra.mxu0 %v3217_v50  ;;  %v2189_v8 = vadd.f32 %v4740_v4, %v5915_v54 }
 0x32c   :  { %v2183_v9 = vpop.f32.mrf.mxu1  ;;  %4942 = vmatprep.subr.mxu0 %v3216_v41 }
 0x32d   :  { %v2184_v10 = vadd.f32 %v5915_v54, %v2183_v9  ;;  %4847 = vmatprep.mubr.msk.f32.mxu0 %vm1252_vm1, %v2484_v5  ;;  %4943 = vmatpush3.msra.mxu0 %v3216_v41  ;;  %v2487_v15 = vmax.f32 %v2189_v8, 0.0 }
 0x32e   :  { %v4743_v12 = vpop.f32.mrf.mxu1  ;;  %4848 = vmatmul.mubr.msk.f32.gmra.mxu0 %vm1252_vm1, %v2485_v7  ;;  %4944 = vmatprep.subr.mxu0 %v5895_v51 }
 0x32f   :  { %v2486_v13 = vmax.f32 %v2184_v10, 0.0  ;;  %v2199_v16 = vadd.f32 %v4743_v12, %v5915_v54  ;;  %4945 = vmatpush3.msra.mxu0 %v5895_v51 }
 0x330   :  { %v2193_v17 = vpop.f32.mrf.mxu1  ;;  %4946 = vmatprep.subr.mxu0 %v5902_v52 }
 0x331   :  { %v2194_v18 = vadd.f32 %v5915_v54, %v2193_v17  ;;  %4850 = vmatprep.mubr.msk.f32.mxu0 %vm1252_vm1, %v2486_v13  ;;  %v2489_v24 = vmax.f32 %v2199_v16, 0.0  ;;  %4947 = vmatpush3.msra.mxu0 %v5902_v52 }
 0x332   :  { %v4746_v20 = vpop.f32.mrf.mxu1  ;;  %4851 = vmatmul.mubr.msk.f32.gmra.mxu0 %vm1252_vm1, %v2487_v15  ;;  %4948 = vmatprep.subr.mxu0 %v5909_v53 }
 0x333   :  { %v2488_v21 = vmax.f32 %v2194_v18, 0.0  ;;  %v2209_v25 = vadd.f32 %v4746_v20, %v5915_v54  ;;  %4949 = vmatpush3.msra.mxu0 %v5909_v53 }
 0x334   :  { %v2203_v26 = vpop.f32.mrf.mxu1  ;;  %4950 = vmatprep.subr.mxu0 %v5923_v59 }
 0x335   :  { %v2204_v27 = vadd.f32 %v5915_v54, %v2203_v26  ;;  %4853 = vmatprep.mubr.msk.f32.mxu0 %vm1252_vm1, %v2488_v21  ;;  %v2491_v31 = vmax.f32 %v2209_v25, 0.0  ;;  %4951 = vmatpush3.msra.mxu0 %v5923_v59 }
 0x336   :  { %v4749_v28 = vpop.f32.mrf.mxu1  ;;  %4854 = vmatmul.mubr.msk.f32.gmra.mxu0 %vm1252_vm1, %v2489_v24  ;;  %4952 = vmatprep.subr.mxu0 %v5930_v62 }
 0x337   :  { %v2490_v29 = vmax.f32 %v2204_v27, 0.0  ;;  %v2219_v32 = vadd.f32 %v4749_v28, %v5915_v54  ;;  %4953 = vmatpush3.msra.mxu0 %v5930_v62 }
 0x338   :  { %v2213_v33 = vpop.f32.mrf.mxu1  ;;  %4954 = vmatprep.subr.mxu0 %v5940_v3 }
 0x339   :  { %v2214_v34 = vadd.f32 %v5915_v54, %v2213_v33  ;;  %4856 = vmatprep.mubr.msk.f32.mxu0 %vm1252_vm1, %v2490_v29  ;;  %v2493_v37 = vmax.f32 %v2219_v32, 0.0  ;;  %4955 = vmatpush3.msra.mxu0 %v5940_v3 }
 0x33a   :  { %v4752_v35 = vpop.f32.mrf.mxu1  ;;  %4857 = vmatmul.mubr.msk.f32.gmra.mxu0 %vm1252_vm1, %v2491_v31  ;;  %4956 = vmatprep.subr.mxu0 %v5948_v6 }
 0x33b   :  { %v2492_v36 = vmax.f32 %v2214_v34, 0.0  ;;  %v2229_v38 = vadd.f32 %v4752_v35, %v5915_v54  ;;  %4957 = vmatpush3.msra.mxu0 %v5948_v6 }
 0x33c   :  { %v2223_v39 = vpop.f32.mrf.mxu1  ;;  %4958 = vmatprep.subr.mxu0 %v5958_v11 }
 0x33d   :  { %v2224_v23 = vadd.f32 %v5915_v54, %v2223_v39  ;;  %4859 = vmatprep.mubr.msk.f32.mxu0 %vm1252_vm1, %v2492_v36  ;;  %v2495_v43 = vmax.f32 %v2229_v38, 0.0  ;;  %4959 = vmatpush3.msra.mxu0 %v5958_v11 }
 0x33e   :  { %v4755_v40 = vpop.f32.mrf.mxu1  ;;  %4860 = vmatmul.mubr.msk.f32.gmra.mxu0 %vm1252_vm1, %v2493_v37  ;;  %4960 = vmatprep.subr.mxu0 %v5966_v14 }
 0x33f   :  { %v2494_v42 = vmax.f32 %v2224_v23, 0.0  ;;  %v2239_v44 = vadd.f32 %v4755_v40, %v5915_v54  ;;  %4961 = vmatpush3.msra.mxu0 %v5966_v14 }
 0x340   :  { %v2233_v45 = vpop.f32.mrf.mxu1  ;;  %4962 = vmatprep.subr.mxu0 %v5977_v19 }
 0x341   :  { %v2234_v46 = vadd.f32 %v5915_v54, %v2233_v45  ;;  %4862 = vmatprep.mubr.msk.f32.mxu0 %vm1252_vm1, %v2494_v42  ;;  %v2497_v49 = vmax.f32 %v2239_v44, 0.0  ;;  %4963 = vmatpush3.msra.mxu0 %v5977_v19 }
 0x342   :  { %v4758_v47 = vpop.f32.mrf.mxu1  ;;  %4863 = vmatmul.mubr.msk.f32.gmra.mxu0 %vm1252_vm1, %v2495_v43  ;;  %4964 = vmatprep.subr.mxu0 %v5986_v22 }
 0x343   :  { %v2496_v48 = vmax.f32 %v2234_v46, 0.0  ;;  %v2249_v50 = vadd.f32 %v4758_v47, %v5915_v54  ;;  %4965 = vmatpush3.msra.mxu0 %v5986_v22 }
 0x344   :  { %v2243_v41 = vpop.f32.mrf.mxu1  ;;  %4966 = vmatprep.subr.mxu0 %v3204_v30 }
 0x345   :  { %v2244_v51 = vadd.f32 %v5915_v54, %v2243_v41  ;;  %4865 = vmatprep.mubr.msk.f32.mxu0 %vm1252_vm1, %v2496_v48  ;;  %v2499_v55 = vmax.f32 %v2249_v50, 0.0  ;;  %4967 = vmatpush3.msra.mxu0 %v3204_v30  ;;  %v3203_v50 = vld [vmem:[%s6537_s12 + $0x8] sm:$0xff] }
 0x346   :  { %v4761_v52 = vpop.f32.mrf.mxu1  ;;  %4866 = vmatmul.mubr.msk.f32.gmra.mxu0 %vm1252_vm1, %v2497_v49  ;;  %5082 = vmatprep.subr.mxu1 %v3203_v50 }
 0x347   :  { %v2498_v53 = vmax.f32 %v2244_v51, 0.0  ;;  %v2259_v56 = vadd.f32 %v4761_v52, %v5915_v54  ;;  %4968 = vmatprep.subr.mxu0 %v3203_v50  ;;  %5098 = vmatpush3.msra.mxu1 %v3203_v50  ;;  %v3202_v52 = vld [vmem:[%s6537_s12] sm:$0xff] }
 0x348   :  { %v2253_v57 = vpop.f32.mrf.mxu1  ;;  %4969 = vmatpush3.msra.mxu0 %v3203_v50  ;;  %5083 = vmatprep.subr.mxu1 %v3202_v52 }
 0x349   :  { %v2254_v58 = vadd.f32 %v5915_v54, %v2253_v57  ;;  %4868 = vmatprep.mubr.msk.f32.mxu0 %vm1252_vm1, %v2498_v53  ;;  %v2501_v61 = vmax.f32 %v2259_v56, 0.0  ;;  %4970 = vmatprep.subr.mxu0 %v3202_v52 }
 0x34a   :  { %v4764_v59 = vpop.f32.mrf.mxu1  ;;  %4869 = vmatmul.mubr.msk.f32.gmra.mxu0 %vm1252_vm1, %v2499_v55  ;;  %5099 = vmatpush3.msra.mxu1 %v3202_v52 }
 0x34b   :  { %v2500_v60 = vmax.f32 %v2254_v58, 0.0  ;;  %v2269_v62 = vadd.f32 %v4764_v59, %v5915_v54  ;;  %4971 = vmatpush3.msra.mxu0 %v3202_v52 }
 0x34c   :  { %v2263_v63 = vpop.f32.mrf.mxu1 }
 0x34d   :  { %v2264_v0 = vadd.f32 %v5915_v54, %v2263_v63  ;;  %4871 = vmatprep.mubr.msk.f32.mxu0 %vm1252_vm1, %v2500_v60  ;;  %v2503_v3 = vmax.f32 %v2269_v62, 0.0 }
 0x34e   :  { %v4767_v1 = vpop.f32.mrf.mxu1  ;;  %4872 = vmatmul.mubr.msk.f32.gmra.mxu0 %vm1252_vm1, %v2501_v61 }
 0x34f   :  { %v2502_v2 = vmax.f32 %v2264_v0, 0.0  ;;  %v2279_v4 = vadd.f32 %v4767_v1, %v5915_v54 }
 0x350   :  { %v2273_v5 = vpop.f32.mrf.mxu1 }
 0x351   :  { %v2274_v6 = vadd.f32 %v5915_v54, %v2273_v5  ;;  %4874 = vmatprep.mubr.msk.f32.mxu0 %vm1252_vm1, %v2502_v2  ;;  %v2505_v9 = vmax.f32 %v2279_v4, 0.0 }
 0x352   :  { %v4770_v7 = vpop.f32.mrf.mxu1  ;;  %4875 = vmatmul.mubr.msk.f32.gmra.mxu0 %vm1252_vm1, %v2503_v3 }
 0x353   :  { %v2504_v8 = vmax.f32 %v2274_v6, 0.0  ;;  %v2289_v10 = vadd.f32 %v4770_v7, %v5915_v54 }
 0x354   :  { %v2283_v11 = vpop.f32.mrf.mxu1 }
 0x355   :  { %v2284_v12 = vadd.f32 %v5915_v54, %v2283_v11  ;;  %4877 = vmatprep.mubr.msk.f32.mxu0 %vm1252_vm1, %v2504_v8  ;;  %v2507_v15 = vmax.f32 %v2289_v10, 0.0 }
 0x356   :  { %v4773_v13 = vpop.f32.mrf.mxu1  ;;  %4878 = vmatmul.mubr.msk.f32.gmra.mxu0 %vm1252_vm1, %v2505_v9 }
 0x357   :  { %v2506_v14 = vmax.f32 %v2284_v12, 0.0  ;;  %v2299_v16 = vadd.f32 %v4773_v13, %v5915_v54 }
 0x358   :  { %v2293_v17 = vpop.f32.mrf.mxu1 }
 0x359   :  { %v2294_v18 = vadd.f32 %v5915_v54, %v2293_v17  ;;  %4880 = vmatprep.mubr.msk.f32.mxu0 %vm1252_vm1, %v2506_v14  ;;  %v2509_v21 = vmax.f32 %v2299_v16, 0.0 }
 0x35a   :  { %v4776_v19 = vpop.f32.mrf.mxu1  ;;  %4881 = vmatmul.mubr.msk.f32.gmra.mxu0 %vm1252_vm1, %v2507_v15 }
 0x35b   :  { %v2508_v20 = vmax.f32 %v2294_v18, 0.0  ;;  %v2309_v22 = vadd.f32 %v4776_v19, %v5915_v54 }
 0x35c   :  { %v2303_v24 = vpop.f32.mrf.mxu1 }
 0x35d   :  { %v2304_v25 = vadd.f32 %v5915_v54, %v2303_v24  ;;  %4883 = vmatprep.mubr.msk.f32.mxu0 %vm1252_vm1, %v2508_v20  ;;  %v2511_v28 = vmax.f32 %v2309_v22, 0.0 }
 0x35e   :  { %v4779_v26 = vpop.f32.mrf.mxu1  ;;  %4884 = vmatmul.mubr.msk.f32.gmra.mxu0 %vm1252_vm1, %v2509_v21 }
 0x35f   :  { %v2510_v27 = vmax.f32 %v2304_v25, 0.0  ;;  %v2319_v29 = vadd.f32 %v4779_v26, %v5915_v54 }
 0x360   :  { %v2313_v30 = vpop.f32.mrf.mxu1 }
 0x361   :  { %v2314_v31 = vadd.f32 %v5915_v54, %v2313_v30  ;;  %4886 = vmatprep.mubr.msk.f32.mxu0 %vm1252_vm1, %v2510_v27  ;;  %v2513_v34 = vmax.f32 %v2319_v29, 0.0 }
 0x362   :  { %v4782_v32 = vpop.f32.mrf.mxu1  ;;  %4887 = vmatmul.mubr.msk.f32.gmra.mxu0 %vm1252_vm1, %v2511_v28 }
 0x363   :  { %v2512_v33 = vmax.f32 %v2314_v31, 0.0  ;;  %v2329_v35 = vadd.f32 %v4782_v32, %v5915_v54 }
 0x364   :  { %v2323_v36 = vpop.f32.mrf.mxu1 }
 0x365   :  { %v2324_v37 = vadd.f32 %v5915_v54, %v2323_v36  ;;  %4889 = vmatprep.mubr.msk.f32.mxu0 %vm1252_vm1, %v2512_v33  ;;  %v2515_v23 = vmax.f32 %v2329_v35, 0.0 }
 0x366   :  { %v4785_v38 = vpop.f32.mrf.mxu1  ;;  %4890 = vmatmul.mubr.msk.f32.gmra.mxu0 %vm1252_vm1, %v2513_v34 }
 0x367   :  { %v2514_v39 = vmax.f32 %v2324_v37, 0.0  ;;  %v2339_v40 = vadd.f32 %v4785_v38, %v5915_v54 }
 0x368   :  { %v2333_v42 = vpop.f32.mrf.mxu1 }
 0x369   :  { %v2334_v43 = vadd.f32 %v5915_v54, %v2333_v42  ;;  %4892 = vmatprep.mubr.msk.f32.mxu0 %vm1252_vm1, %v2514_v39  ;;  %v2517_v46 = vmax.f32 %v2339_v40, 0.0 }
 0x36a   :  { %v4788_v44 = vpop.f32.mrf.mxu1  ;;  %4893 = vmatmul.mubr.msk.f32.gmra.mxu0 %vm1252_vm1, %v2515_v23 }
 0x36b   :  { %v2516_v45 = vmax.f32 %v2334_v43, 0.0  ;;  %v2349_v47 = vadd.f32 %v4788_v44, %v5915_v54 }
 0x36c   :  { %v2343_v48 = vpop.f32.mrf.mxu1 }
 0x36d   :  { %v2344_v49 = vadd.f32 %v5915_v54, %v2343_v48  ;;  %4895 = vmatprep.mubr.msk.f32.mxu0 %vm1252_vm1, %v2516_v45  ;;  %v2519_v53 = vmax.f32 %v2349_v47, 0.0 }
 0x36e   :  { %v4791_v41 = vpop.f32.mrf.mxu1  ;;  %4896 = vmatmul.mubr.msk.f32.gmra.mxu0 %vm1252_vm1, %v2517_v46 }
 0x36f   :  { %v2518_v51 = vmax.f32 %v2344_v49, 0.0  ;;  %v2359_v55 = vadd.f32 %v4791_v41, %v5915_v54 }
 0x370   :  { %v2353_v56 = vpop.f32.mrf.mxu1 }
 0x371   :  { %v2354_v57 = vadd.f32 %v5915_v54, %v2353_v56  ;;  %4898 = vmatprep.mubr.msk.f32.mxu0 %vm1252_vm1, %v2518_v51  ;;  %v2521_v60 = vmax.f32 %v2359_v55, 0.0 }
 0x372   :  { %v4794_v58 = vpop.f32.mrf.mxu1  ;;  %4899 = vmatmul.mubr.msk.f32.gmra.mxu0 %vm1252_vm1, %v2519_v53 }
 0x373   :  { %v2520_v59 = vmax.f32 %v2354_v57, 0.0  ;;  %v2369_v61 = vadd.f32 %v4794_v58, %v5915_v54 }
 0x374   :  { %v2363_v62 = vpop.f32.mrf.mxu1 }
 0x375   :  { %v2364_v63 = vadd.f32 %v5915_v54, %v2363_v62  ;;  %4901 = vmatprep.mubr.msk.f32.mxu0 %vm1252_vm1, %v2520_v59  ;;  %v2523_v2 = vmax.f32 %v2369_v61, 0.0 }
 0x376   :  { %v4797_v0 = vpop.f32.mrf.mxu1  ;;  %4902 = vmatmul.mubr.msk.f32.gmra.mxu0 %vm1252_vm1, %v2521_v60 }
 0x377   :  { %v2522_v1 = vmax.f32 %v2364_v63, 0.0  ;;  %v2379_v3 = vadd.f32 %v4797_v0, %v5915_v54 }
 0x378   :  { %v2373_v4 = vpop.f32.mrf.mxu1 }
 0x379   :  { %v2374_v5 = vadd.f32 %v5915_v54, %v2373_v4  ;;  %4904 = vmatprep.mubr.msk.f32.mxu0 %vm1252_vm1, %v2522_v1  ;;  %v2525_v8 = vmax.f32 %v2379_v3, 0.0 }
 0x37a   :  { %v4800_v6 = vpop.f32.mrf.mxu1  ;;  %4905 = vmatmul.mubr.msk.f32.gmra.mxu0 %vm1252_vm1, %v2523_v2 }
 0x37b   :  { %v2524_v7 = vmax.f32 %v2374_v5, 0.0  ;;  %v2389_v9 = vadd.f32 %v4800_v6, %v5915_v54  ;;  %v6136_v5 = vld [vmem:[%s6539_s11] ss:$0 sm:$0xff] }
 0x37c   :  { %v2383_v10 = vpop.f32.mrf.mxu1 }
 0x37d   :  { %v2384_v11 = vadd.f32 %v5915_v54, %v2383_v10  ;;  %4907 = vmatprep.mubr.msk.f32.mxu0 %vm1252_vm1, %v2524_v7  ;;  %v2527_v14 = vmax.f32 %v2389_v9, 0.0 }
 0x37e   :  { %v4803_v12 = vpop.f32.mrf.mxu1  ;;  %4908 = vmatmul.mubr.msk.f32.gmra.mxu0 %vm1252_vm1, %v2525_v8 }
 0x37f   :  { %v2526_v13 = vmax.f32 %v2384_v11, 0.0  ;;  %v2399_v15 = vadd.f32 %v4803_v12, %v5915_v54 }
 0x380   :  { %v2393_v16 = vpop.f32.mrf.mxu1 }
 0x381   :  { %v2394_v17 = vadd.f32 %v5915_v54, %v2393_v16  ;;  %4910 = vmatprep.mubr.msk.f32.mxu0 %vm1252_vm1, %v2526_v13  ;;  %v2529_v20 = vmax.f32 %v2399_v15, 0.0 }
 0x382   :  { %v4806_v18 = vpop.f32.mrf.mxu1  ;;  %4911 = vmatmul.mubr.msk.f32.gmra.mxu0 %vm1252_vm1, %v2527_v14 }
 0x383   :  { %v2528_v19 = vmax.f32 %v2394_v17, 0.0  ;;  %v2409_v21 = vadd.f32 %v4806_v18, %v5915_v54 }
 0x384   :  { %v2403_v22 = vpop.f32.mrf.mxu1 }
 0x385   :  { %v2404_v24 = vadd.f32 %v5915_v54, %v2403_v22  ;;  %4913 = vmatprep.mubr.msk.f32.mxu0 %vm1252_vm1, %v2528_v19  ;;  %v2531_v27 = vmax.f32 %v2409_v21, 0.0 }
 0x386   :  { %v4809_v25 = vpop.f32.mrf.mxu1  ;;  %4914 = vmatmul.mubr.msk.f32.gmra.mxu0 %vm1252_vm1, %v2529_v20 }
 0x387   :  { %v2530_v26 = vmax.f32 %v2404_v24, 0.0  ;;  %v2419_v28 = vadd.f32 %v4809_v25, %v5915_v54 }
 0x388   :  { %v2413_v29 = vpop.f32.mrf.mxu1 }
 0x389   :  { %v2414_v30 = vadd.f32 %v5915_v54, %v2413_v29  ;;  %4916 = vmatprep.mubr.msk.f32.mxu0 %vm1252_vm1, %v2530_v26  ;;  %v2533_v33 = vmax.f32 %v2419_v28, 0.0 }
 0x38a   :  { %v4812_v31 = vpop.f32.mrf.mxu1  ;;  %4917 = vmatmul.mubr.msk.f32.gmra.mxu0 %vm1252_vm1, %v2531_v27 }
 0x38b   :  { %v2532_v32 = vmax.f32 %v2414_v30, 0.0  ;;  %v2429_v34 = vadd.f32 %v4812_v31, %v5915_v54 }
 0x38c   :  { %v2423_v35 = vpop.f32.mrf.mxu1 }
 0x38d   :  { %v2424_v36 = vadd.f32 %v5915_v54, %v2423_v35  ;;  %4919 = vmatprep.mubr.msk.f32.mxu0 %vm1252_vm1, %v2532_v32  ;;  %v2535_v39 = vmax.f32 %v2429_v34, 0.0 }
 0x38e   :  { %v4815_v37 = vpop.f32.mrf.mxu1  ;;  %4920 = vmatmul.mubr.msk.f32.gmra.mxu0 %vm1252_vm1, %v2533_v33 }
 0x38f   :  { %v2534_v38 = vmax.f32 %v2424_v36, 0.0  ;;  %v2439_v23 = vadd.f32 %v4815_v37, %v5915_v54 }
 0x390   :  { %v2433_v40 = vpop.f32.mrf.mxu1 }
 0x391   :  { %v2434_v42 = vadd.f32 %v5915_v54, %v2433_v40  ;;  %4922 = vmatprep.mubr.msk.f32.mxu0 %vm1252_vm1, %v2534_v38  ;;  %v2537_v45 = vmax.f32 %v2439_v23, 0.0 }
 0x392   :  { %v4818_v43 = vpop.f32.mrf.mxu1  ;;  %4923 = vmatmul.mubr.msk.f32.gmra.mxu0 %vm1252_vm1, %v2535_v39 }
 0x393   :  { %v2536_v44 = vmax.f32 %v2434_v42, 0.0  ;;  %v2449_v46 = vadd.f32 %v4818_v43, %v5915_v54 }
 0x394   :  { %v2443_v47 = vpop.f32.mrf.mxu1 }
 0x395   :  { %v2444_v48 = vadd.f32 %v5915_v54, %v2443_v47  ;;  %4925 = vmatprep.mubr.msk.f32.mxu0 %vm1252_vm1, %v2536_v44  ;;  %v2539_v41 = vmax.f32 %v2449_v46, 0.0 }
 0x396   :  { %v4821_v49 = vpop.f32.mrf.mxu1  ;;  %4926 = vmatmul.mubr.msk.f32.gmra.mxu0 %vm1252_vm1, %v2537_v45 }
 0x397   :  { %v2538_v50 = vmax.f32 %v2444_v48, 0.0  ;;  %v2459_v51 = vadd.f32 %v4821_v49, %v5915_v54 }
 0x398   :  { %v2453_v52 = vpop.f32.mrf.mxu1 }
 0x399   :  { %v2454_v53 = vadd.f32 %v5915_v54, %v2453_v52  ;;  %4928 = vmatprep.mubr.msk.f32.mxu0 %vm1252_vm1, %v2538_v50  ;;  %v2541_v57 = vmax.f32 %v2459_v51, 0.0 }
 0x39a   :  { %v4824_v55 = vpop.f32.mrf.mxu1  ;;  %4929 = vmatmul.mubr.msk.f32.gmra.mxu0 %vm1252_vm1, %v2539_v41 }
 0x39b   :  { %v2540_v56 = vmax.f32 %v2454_v53, 0.0  ;;  %v2469_v58 = vadd.f32 %v4824_v55, %v5915_v54 }
 0x39c   :  { %v2463_v59 = vpop.f32.mrf.mxu1 }
 0x39d   :  { %v2464_v60 = vadd.f32 %v5915_v54, %v2463_v59  ;;  %4931 = vmatprep.mubr.msk.f32.mxu0 %vm1252_vm1, %v2540_v56  ;;  %v2543_v63 = vmax.f32 %v2469_v58, 0.0 }
 0x39e   :  { %v4827_v61 = vpop.f32.mrf.mxu1  ;;  %4932 = vmatmul.mubr.msk.f32.gmra.mxu0 %vm1252_vm1, %v2541_v57 }
 0x39f   :  { %v2542_v62 = vmax.f32 %v2464_v60, 0.0  ;;  %v2479_v0 = vadd.f32 %v4827_v61, %v5915_v54 }
 0x3a0   :  { %v2473_v1 = vpop.f32.mrf.mxu1 }
 0x3a1   :  { %v2474_v2 = vadd.f32 %v5915_v54, %v2473_v1  ;;  %4934 = vmatprep.mubr.msk.f32.mxu0 %vm1252_vm1, %v2542_v62  ;;  %v2545_v4 = vmax.f32 %v2479_v0, 0.0 }
 0x3a2   :  { %4935 = vmatmul.mubr.msk.f32.gmra.mxu0 %vm1252_vm1, %v2543_v63 }
 0x3a3   :  { %v2544_v3 = vmax.f32 %v2474_v2, 0.0 }
 0x3a5   :  { %4937 = vmatprep.mubr.msk.f32.mxu0 %vm1252_vm1, %v2544_v3 }
 0x3a6   :  { %4938 = vmatmul.mubr.msk.f32.gmra.mxu0 %vm1252_vm1, %v2545_v4 }
 0x3ea   :  { %v4846_v6 = vpop.f32.mrf.mxu0 }
 0x3eb   :  { %v2825_v7 = vadd.f32 %v4846_v6, %v6136_v5 }
 0x3ec   :  { %v2819_v8 = vpop.f32.mrf.mxu0 }
 0x3ed   :  { %v2820_v54 = vadd.f32 %v6136_v5, %v2819_v8  ;;  %v3139_v11 = vmax.f32 %v2825_v7, 0.0 }
 0x3ee   :  { %v4849_v9 = vpop.f32.mrf.mxu0 }
 0x3ef   :  { %v3138_v10 = vmax.f32 %v2820_v54, 0.0  ;;  %v2835_v12 = vadd.f32 %v4849_v9, %v6136_v5 }
 0x3f0   :  { %v2829_v13 = vpop.f32.mrf.mxu0 }
 0x3f1   :  { %v2830_v14 = vadd.f32 %v6136_v5, %v2829_v13  ;;  %4972 = vmatprep.mubr.f32.mxu0 %v3138_v10  ;;  %v3141_v17 = vmax.f32 %v2835_v12, 0.0 }
 0x3f2   :  { %v4852_v15 = vpop.f32.mrf.mxu0  ;;  %4973 = vmatmul.mubr.f32.vlgmr.msra.gmra.mxu0 %v3139_v11 }
 0x3f3   :  { %v3140_v16 = vmax.f32 %v2830_v14, 0.0  ;;  %v2845_v18 = vadd.f32 %v4852_v15, %v6136_v5 }
 0x3f4   :  { %v2839_v19 = vpop.f32.mrf.mxu0 }
 0x3f5   :  { %v2840_v20 = vadd.f32 %v6136_v5, %v2839_v19  ;;  %4975 = vmatprep.mubr.f32.mxu0 %v3140_v16  ;;  %v3143_v24 = vmax.f32 %v2845_v18, 0.0 }
 0x3f6   :  { %v4855_v21 = vpop.f32.mrf.mxu0  ;;  %4976 = vmatmul.mubr.f32.gmra.mxu0 %v3141_v17 }
 0x3f7   :  { %v3142_v22 = vmax.f32 %v2840_v20, 0.0  ;;  %v2855_v25 = vadd.f32 %v4855_v21, %v6136_v5 }
 0x3f8   :  { %v2849_v26 = vpop.f32.mrf.mxu0 }
 0x3f9   :  { %v2850_v27 = vadd.f32 %v6136_v5, %v2849_v26  ;;  %4978 = vmatprep.mubr.f32.mxu0 %v3142_v22  ;;  %v3145_v30 = vmax.f32 %v2855_v25, 0.0 }
 0x3fa   :  { %v4858_v28 = vpop.f32.mrf.mxu0  ;;  %4979 = vmatmul.mubr.f32.gmra.mxu0 %v3143_v24 }
 0x3fb   :  { %v3144_v29 = vmax.f32 %v2850_v27, 0.0  ;;  %v2865_v31 = vadd.f32 %v4858_v28, %v6136_v5 }
 0x3fc   :  { %v2859_v32 = vpop.f32.mrf.mxu0 }
 0x3fd   :  { %v2860_v33 = vadd.f32 %v6136_v5, %v2859_v32  ;;  %4981 = vmatprep.mubr.f32.mxu1 %v3144_v29  ;;  %v3147_v36 = vmax.f32 %v2865_v31, 0.0 }
 0x3fe   :  { %v4861_v34 = vpop.f32.mrf.mxu0  ;;  %4982 = vmatmul.mubr.f32.vlgmr.msra.gmra.mxu1 %v3145_v30 }
 0x3ff   :  { %v3146_v35 = vmax.f32 %v2860_v33, 0.0  ;;  %v2875_v37 = vadd.f32 %v4861_v34, %v6136_v5 }
 0x400   :  { %v2869_v38 = vpop.f32.mrf.mxu0 }
 0x401   :  { %v2870_v39 = vadd.f32 %v6136_v5, %v2869_v38  ;;  %4984 = vmatprep.mubr.f32.mxu1 %v3146_v35  ;;  %v3149_v42 = vmax.f32 %v2875_v37, 0.0 }
 0x402   :  { %v4864_v23 = vpop.f32.mrf.mxu0  ;;  %4985 = vmatmul.mubr.f32.gmra.mxu1 %v3147_v36 }
 0x403   :  { %v3148_v40 = vmax.f32 %v2870_v39, 0.0  ;;  %v2885_v43 = vadd.f32 %v4864_v23, %v6136_v5 }
 0x404   :  { %v2879_v44 = vpop.f32.mrf.mxu0 }
 0x405   :  { %v2880_v45 = vadd.f32 %v6136_v5, %v2879_v44  ;;  %4987 = vmatprep.mubr.f32.mxu1 %v3148_v40  ;;  %v3151_v48 = vmax.f32 %v2885_v43, 0.0 }
 0x406   :  { %v4867_v46 = vpop.f32.mrf.mxu0  ;;  %4988 = vmatmul.mubr.f32.gmra.mxu1 %v3149_v42 }
 0x407   :  { %v3150_v47 = vmax.f32 %v2880_v45, 0.0  ;;  %v2895_v49 = vadd.f32 %v4867_v46, %v6136_v5 }
 0x408   :  { %v2889_v50 = vpop.f32.mrf.mxu0 }
 0x409   :  { %v2890_v41 = vadd.f32 %v6136_v5, %v2889_v50  ;;  %4990 = vmatprep.mubr.f32.mxu1 %v3150_v47  ;;  %v3153_v53 = vmax.f32 %v2895_v49, 0.0 }
 0x40a   :  { %v4870_v51 = vpop.f32.mrf.mxu0  ;;  %4991 = vmatmul.mubr.f32.gmra.mxu1 %v3151_v48 }
 0x40b   :  { %v3152_v52 = vmax.f32 %v2890_v41, 0.0  ;;  %v2905_v55 = vadd.f32 %v4870_v51, %v6136_v5 }
 0x40c   :  { %v2899_v56 = vpop.f32.mrf.mxu0 }
 0x40d   :  { %v2900_v57 = vadd.f32 %v6136_v5, %v2899_v56  ;;  %4993 = vmatprep.mubr.f32.mxu1 %v3152_v52  ;;  %v3155_v60 = vmax.f32 %v2905_v55, 0.0 }
 0x40e   :  { %v4873_v58 = vpop.f32.mrf.mxu0  ;;  %4994 = vmatmul.mubr.f32.gmra.mxu1 %v3153_v53 }
 0x40f   :  { %v3154_v59 = vmax.f32 %v2900_v57, 0.0  ;;  %v2915_v61 = vadd.f32 %v4873_v58, %v6136_v5 }
 0x410   :  { %v2909_v62 = vpop.f32.mrf.mxu0 }
 0x411   :  { %v2910_v63 = vadd.f32 %v6136_v5, %v2909_v62  ;;  %4996 = vmatprep.mubr.f32.mxu1 %v3154_v59  ;;  %v3157_v2 = vmax.f32 %v2915_v61, 0.0 }
 0x412   :  { %v4876_v0 = vpop.f32.mrf.mxu0  ;;  %4997 = vmatmul.mubr.f32.gmra.mxu1 %v3155_v60 }
 0x413   :  { %v3156_v1 = vmax.f32 %v2910_v63, 0.0  ;;  %v2925_v3 = vadd.f32 %v4876_v0, %v6136_v5 }
 0x414   :  { %v2919_v4 = vpop.f32.mrf.mxu0 }
 0x415   :  { %v2920_v6 = vadd.f32 %v6136_v5, %v2919_v4  ;;  %4999 = vmatprep.mubr.f32.mxu1 %v3156_v1  ;;  %v3159_v54 = vmax.f32 %v2925_v3, 0.0 }
 0x416   :  { %v4879_v7 = vpop.f32.mrf.mxu0  ;;  %5000 = vmatmul.mubr.f32.gmra.mxu1 %v3157_v2 }
 0x417   :  { %v3158_v8 = vmax.f32 %v2920_v6, 0.0  ;;  %v2935_v9 = vadd.f32 %v4879_v7, %v6136_v5 }
 0x418   :  { %v2929_v10 = vpop.f32.mrf.mxu0 }
 0x419   :  { %v2930_v11 = vadd.f32 %v6136_v5, %v2929_v10  ;;  %5002 = vmatprep.mubr.f32.mxu1 %v3158_v8  ;;  %v3161_v14 = vmax.f32 %v2935_v9, 0.0 }
 0x41a   :  { %v4882_v12 = vpop.f32.mrf.mxu0  ;;  %5003 = vmatmul.mubr.f32.gmra.mxu1 %v3159_v54 }
 0x41b   :  { %v3160_v13 = vmax.f32 %v2930_v11, 0.0  ;;  %v2945_v15 = vadd.f32 %v4882_v12, %v6136_v5 }
 0x41c   :  { %v2939_v16 = vpop.f32.mrf.mxu0 }
 0x41d   :  { %v2940_v17 = vadd.f32 %v6136_v5, %v2939_v16  ;;  %5005 = vmatprep.mubr.f32.mxu1 %v3160_v13  ;;  %v3163_v20 = vmax.f32 %v2945_v15, 0.0 }
 0x41e   :  { %v4885_v18 = vpop.f32.mrf.mxu0  ;;  %5006 = vmatmul.mubr.f32.gmra.mxu1 %v3161_v14 }
 0x41f   :  { %v3162_v19 = vmax.f32 %v2940_v17, 0.0  ;;  %v2955_v21 = vadd.f32 %v4885_v18, %v6136_v5 }
 0x420   :  { %v2949_v22 = vpop.f32.mrf.mxu0 }
 0x421   :  { %v2950_v24 = vadd.f32 %v6136_v5, %v2949_v22  ;;  %5008 = vmatprep.mubr.f32.mxu1 %v3162_v19  ;;  %v3165_v27 = vmax.f32 %v2955_v21, 0.0 }
 0x422   :  { %v4888_v25 = vpop.f32.mrf.mxu0  ;;  %5009 = vmatmul.mubr.f32.gmra.mxu1 %v3163_v20 }
 0x423   :  { %v3164_v26 = vmax.f32 %v2950_v24, 0.0  ;;  %v2965_v28 = vadd.f32 %v4888_v25, %v6136_v5 }
 0x424   :  { %v2959_v29 = vpop.f32.mrf.mxu0 }
 0x425   :  { %v2960_v30 = vadd.f32 %v6136_v5, %v2959_v29  ;;  %5011 = vmatprep.mubr.f32.mxu1 %v3164_v26  ;;  %v3167_v33 = vmax.f32 %v2965_v28, 0.0 }
 0x426   :  { %v4891_v31 = vpop.f32.mrf.mxu0  ;;  %5012 = vmatmul.mubr.f32.gmra.mxu1 %v3165_v27 }
 0x427   :  { %v3166_v32 = vmax.f32 %v2960_v30, 0.0  ;;  %v2975_v34 = vadd.f32 %v4891_v31, %v6136_v5 }
 0x428   :  { %v2969_v35 = vpop.f32.mrf.mxu0 }
 0x429   :  { %v2970_v36 = vadd.f32 %v6136_v5, %v2969_v35  ;;  %5014 = vmatprep.mubr.f32.mxu1 %v3166_v32  ;;  %v3169_v39 = vmax.f32 %v2975_v34, 0.0 }
 0x42a   :  { %v4894_v37 = vpop.f32.mrf.mxu0  ;;  %5015 = vmatmul.mubr.f32.gmra.mxu1 %v3167_v33 }
 0x42b   :  { %v3168_v38 = vmax.f32 %v2970_v36, 0.0  ;;  %v2985_v23 = vadd.f32 %v4894_v37, %v6136_v5 }
 0x42c   :  { %v2979_v40 = vpop.f32.mrf.mxu0 }
 0x42d   :  { %v2980_v42 = vadd.f32 %v6136_v5, %v2979_v40  ;;  %5017 = vmatprep.mubr.f32.mxu1 %v3168_v38  ;;  %v3171_v45 = vmax.f32 %v2985_v23, 0.0 }
 0x42e   :  { %v4897_v43 = vpop.f32.mrf.mxu0  ;;  %5018 = vmatmul.mubr.f32.gmra.mxu1 %v3169_v39 }
 0x42f   :  { %v3170_v44 = vmax.f32 %v2980_v42, 0.0  ;;  %v2995_v46 = vadd.f32 %v4897_v43, %v6136_v5 }
 0x430   :  { %v2989_v47 = vpop.f32.mrf.mxu0 }
 0x431   :  { %v2990_v48 = vadd.f32 %v6136_v5, %v2989_v47  ;;  %5020 = vmatprep.mubr.f32.mxu1 %v3170_v44  ;;  %v3173_v41 = vmax.f32 %v2995_v46, 0.0 }
 0x432   :  { %v4900_v49 = vpop.f32.mrf.mxu0  ;;  %5021 = vmatmul.mubr.f32.gmra.mxu1 %v3171_v45 }
 0x433   :  { %v3172_v50 = vmax.f32 %v2990_v48, 0.0  ;;  %v3005_v51 = vadd.f32 %v4900_v49, %v6136_v5 }
 0x434   :  { %v2999_v52 = vpop.f32.mrf.mxu0 }
 0x435   :  { %v3000_v53 = vadd.f32 %v6136_v5, %v2999_v52  ;;  %5023 = vmatprep.mubr.f32.mxu1 %v3172_v50  ;;  %v3175_v57 = vmax.f32 %v3005_v51, 0.0 }
 0x436   :  { %v4903_v55 = vpop.f32.mrf.mxu0  ;;  %5024 = vmatmul.mubr.f32.gmra.mxu1 %v3173_v41 }
 0x437   :  { %v3174_v56 = vmax.f32 %v3000_v53, 0.0  ;;  %v3015_v58 = vadd.f32 %v4903_v55, %v6136_v5 }
 0x438   :  { %v3009_v59 = vpop.f32.mrf.mxu0 }
 0x439   :  { %v3010_v60 = vadd.f32 %v6136_v5, %v3009_v59  ;;  %5026 = vmatprep.mubr.f32.mxu1 %v3174_v56  ;;  %v3177_v63 = vmax.f32 %v3015_v58, 0.0 }
 0x43a   :  { %v4906_v61 = vpop.f32.mrf.mxu0  ;;  %5027 = vmatmul.mubr.f32.gmra.mxu1 %v3175_v57 }
 0x43b   :  { %v3176_v62 = vmax.f32 %v3010_v60, 0.0  ;;  %v3025_v0 = vadd.f32 %v4906_v61, %v6136_v5 }
 0x43c   :  { %v3019_v1 = vpop.f32.mrf.mxu0 }
 0x43d   :  { %v3020_v2 = vadd.f32 %v6136_v5, %v3019_v1  ;;  %5029 = vmatprep.mubr.f32.mxu1 %v3176_v62  ;;  %v3179_v6 = vmax.f32 %v3025_v0, 0.0 }
 0x43e   :  { %v4909_v3 = vpop.f32.mrf.mxu0  ;;  %5030 = vmatmul.mubr.f32.gmra.mxu1 %v3177_v63 }
 0x43f   :  { %v3178_v4 = vmax.f32 %v3020_v2, 0.0  ;;  %v3035_v7 = vadd.f32 %v4909_v3, %v6136_v5 }
 0x440   :  { %v3029_v8 = vpop.f32.mrf.mxu0 }
 0x441   :  { %v3030_v54 = vadd.f32 %v6136_v5, %v3029_v8  ;;  %5032 = vmatprep.mubr.f32.mxu1 %v3178_v4  ;;  %v3181_v11 = vmax.f32 %v3035_v7, 0.0 }
 0x442   :  { %v4912_v9 = vpop.f32.mrf.mxu0  ;;  %5033 = vmatmul.mubr.f32.gmra.mxu1 %v3179_v6 }
 0x443   :  { %v3180_v10 = vmax.f32 %v3030_v54, 0.0  ;;  %v3045_v12 = vadd.f32 %v4912_v9, %v6136_v5  ;;  %v6205_v54 = vld [vmem:[%s6540_s13] ss:$0 sm:$0xff] }
 0x444   :  { %v3039_v13 = vpop.f32.mrf.mxu0 }
 0x445   :  { %v3040_v14 = vadd.f32 %v6136_v5, %v3039_v13  ;;  %5035 = vmatprep.mubr.f32.mxu1 %v3180_v10  ;;  %v3183_v17 = vmax.f32 %v3045_v12, 0.0 }
 0x446   :  { %v4915_v15 = vpop.f32.mrf.mxu0  ;;  %5036 = vmatmul.mubr.f32.gmra.mxu1 %v3181_v11 }
 0x447   :  { %v3182_v16 = vmax.f32 %v3040_v14, 0.0  ;;  %v3055_v18 = vadd.f32 %v4915_v15, %v6136_v5 }
 0x448   :  { %v3049_v19 = vpop.f32.mrf.mxu0 }
 0x449   :  { %v3050_v20 = vadd.f32 %v6136_v5, %v3049_v19  ;;  %5038 = vmatprep.mubr.f32.mxu1 %v3182_v16  ;;  %v3185_v24 = vmax.f32 %v3055_v18, 0.0 }
 0x44a   :  { %v4918_v21 = vpop.f32.mrf.mxu0  ;;  %5039 = vmatmul.mubr.f32.gmra.mxu1 %v3183_v17 }
 0x44b   :  { %v3184_v22 = vmax.f32 %v3050_v20, 0.0  ;;  %v3065_v25 = vadd.f32 %v4918_v21, %v6136_v5 }
 0x44c   :  { %v3059_v26 = vpop.f32.mrf.mxu0 }
 0x44d   :  { %v3060_v27 = vadd.f32 %v6136_v5, %v3059_v26  ;;  %5041 = vmatprep.mubr.f32.mxu1 %v3184_v22  ;;  %v3187_v30 = vmax.f32 %v3065_v25, 0.0 }
 0x44e   :  { %v4921_v28 = vpop.f32.mrf.mxu0  ;;  %5042 = vmatmul.mubr.f32.gmra.mxu1 %v3185_v24 }
 0x44f   :  { %v3186_v29 = vmax.f32 %v3060_v27, 0.0  ;;  %v3075_v31 = vadd.f32 %v4921_v28, %v6136_v5 }
 0x450   :  { %v3069_v32 = vpop.f32.mrf.mxu0 }
 0x451   :  { %v3070_v33 = vadd.f32 %v6136_v5, %v3069_v32  ;;  %5044 = vmatprep.mubr.f32.mxu1 %v3186_v29  ;;  %v3189_v36 = vmax.f32 %v3075_v31, 0.0 }
 0x452   :  { %v4924_v34 = vpop.f32.mrf.mxu0  ;;  %5045 = vmatmul.mubr.f32.gmra.mxu1 %v3187_v30 }
 0x453   :  { %v3188_v35 = vmax.f32 %v3070_v33, 0.0  ;;  %v3085_v37 = vadd.f32 %v4924_v34, %v6136_v5 }
 0x454   :  { %v3079_v38 = vpop.f32.mrf.mxu0 }
 0x455   :  { %v3080_v39 = vadd.f32 %v6136_v5, %v3079_v38  ;;  %5047 = vmatprep.mubr.f32.mxu1 %v3188_v35  ;;  %v3191_v42 = vmax.f32 %v3085_v37, 0.0 }
 0x456   :  { %v4927_v23 = vpop.f32.mrf.mxu0  ;;  %5048 = vmatmul.mubr.f32.gmra.mxu1 %v3189_v36 }
 0x457   :  { %v3190_v40 = vmax.f32 %v3080_v39, 0.0  ;;  %v3095_v43 = vadd.f32 %v4927_v23, %v6136_v5 }
 0x458   :  { %v3089_v44 = vpop.f32.mrf.mxu0 }
 0x459   :  { %v3090_v45 = vadd.f32 %v6136_v5, %v3089_v44  ;;  %5050 = vmatprep.mubr.f32.mxu1 %v3190_v40  ;;  %v3193_v48 = vmax.f32 %v3095_v43, 0.0 }
 0x45a   :  { %v4930_v46 = vpop.f32.mrf.mxu0  ;;  %5051 = vmatmul.mubr.f32.gmra.mxu1 %v3191_v42 }
 0x45b   :  { %v3192_v47 = vmax.f32 %v3090_v45, 0.0  ;;  %v3105_v49 = vadd.f32 %v4930_v46, %v6136_v5 }
 0x45c   :  { %v3099_v50 = vpop.f32.mrf.mxu0 }
 0x45d   :  { %v3100_v41 = vadd.f32 %v6136_v5, %v3099_v50  ;;  %5053 = vmatprep.mubr.f32.mxu1 %v3192_v47  ;;  %v3195_v53 = vmax.f32 %v3105_v49, 0.0 }
 0x45e   :  { %v4933_v51 = vpop.f32.mrf.mxu0  ;;  %5054 = vmatmul.mubr.f32.gmra.mxu1 %v3193_v48 }
 0x45f   :  { %v3194_v52 = vmax.f32 %v3100_v41, 0.0  ;;  %v3115_v55 = vadd.f32 %v4933_v51, %v6136_v5 }
 0x460   :  { %v3109_v56 = vpop.f32.mrf.mxu0 }
 0x461   :  { %v3110_v57 = vadd.f32 %v6136_v5, %v3109_v56  ;;  %5056 = vmatprep.mubr.f32.mxu1 %v3194_v52  ;;  %v3197_v60 = vmax.f32 %v3115_v55, 0.0 }
 0x462   :  { %v4936_v58 = vpop.f32.mrf.mxu0  ;;  %5057 = vmatmul.mubr.f32.gmra.mxu1 %v3195_v53 }
 0x463   :  { %v3196_v59 = vmax.f32 %v3110_v57, 0.0  ;;  %v3125_v61 = vadd.f32 %v4936_v58, %v6136_v5 }
 0x464   :  { %v3119_v62 = vpop.f32.mrf.mxu0 }
 0x465   :  { %v3120_v63 = vadd.f32 %v6136_v5, %v3119_v62  ;;  %5059 = vmatprep.mubr.f32.mxu1 %v3196_v59  ;;  %v3199_v2 = vmax.f32 %v3125_v61, 0.0 }
 0x466   :  { %v4939_v0 = vpop.f32.mrf.mxu0  ;;  %5060 = vmatmul.mubr.f32.gmra.mxu1 %v3197_v60 }
 0x467   :  { %v3198_v1 = vmax.f32 %v3120_v63, 0.0  ;;  %v3135_v3 = vadd.f32 %v4939_v0, %v6136_v5 }
 0x468   :  { %v3129_v4 = vpop.f32.mrf.mxu0 }
 0x469   :  { %v3130_v6 = vadd.f32 %v6136_v5, %v3129_v4  ;;  %5062 = vmatprep.mubr.f32.mxu1 %v3198_v1  ;;  %v3201_v8 = vmax.f32 %v3135_v3, 0.0 }
 0x46a   :  { %5063 = vmatmul.mubr.f32.gmra.mxu1 %v3199_v2 }
 0x46b   :  { %v3200_v7 = vmax.f32 %v3130_v6, 0.0 }
 0x46d   :  { %5065 = vmatprep.mubr.f32.mxu1 %v3200_v7 }
 0x46e   :  { %5066 = vmatmul.mubr.f32.gmra.mxu1 %v3201_v8 }
 0x4b2   :  { %v4974_v9 = vpop.f32.mrf.mxu0 }
 0x4b3   :  { %v3297_v10 = vadd.f32 %v4974_v9, %v6205_v54 }
 0x4b4   :  { %v3291_v11 = vpop.f32.mrf.mxu0 }
 0x4b5   :  { %3611 = vst.msk [vmem:[%s6541_s14 + $0x8] sm:$0xff] %vm123_vm0, %v3297_v10  ;;  %v3292_v5 = vadd.f32 %v6205_v54, %v3291_v11 }
 0x4b6   :  { %v4977_v12 = vpop.f32.mrf.mxu0 }
 0x4b7   :  { %3610 = vst.msk [vmem:[%s6541_s14] sm:$0xff] %vm123_vm0, %v3292_v5  ;;  %v3307_v13 = vadd.f32 %v4977_v12, %v6205_v54 }
 0x4b8   :  { %v3301_v14 = vpop.f32.mrf.mxu0 }
 0x4b9   :  { %3613 = vst.msk [vmem:[%s6541_s14 + $0x18] sm:$0xff] %vm123_vm0, %v3307_v13  ;;  %v3302_v15 = vadd.f32 %v6205_v54, %v3301_v14 }
 0x4ba   :  { %v4980_v16 = vpop.f32.mrf.mxu0 }
 0x4bb   :  { %3612 = vst.msk [vmem:[%s6541_s14 + $0x10] sm:$0xff] %vm123_vm0, %v3302_v15  ;;  %v3317_v17 = vadd.f32 %v4980_v16, %v6205_v54 }
 0x4bc   :  { %v3311_v18 = vpop.f32.mrf.mxu0 }
 0x4bd   :  { %3615 = vst.msk [vmem:[%s6541_s14 + $0x28] sm:$0xff] %vm123_vm0, %v3317_v17  ;;  %v3312_v19 = vadd.f32 %v6205_v54, %v3311_v18 }
 0x4be   :  { %v4983_v20 = vpop.f32.mrf.mxu1 }
 0x4bf   :  { %3614 = vst.msk [vmem:[%s6541_s14 + $0x20] sm:$0xff] %vm123_vm0, %v3312_v19  ;;  %v3327_v21 = vadd.f32 %v4983_v20, %v6205_v54 }
 0x4c0   :  { %v3321_v22 = vpop.f32.mrf.mxu1 }
 0x4c1   :  { %3617 = vst.msk [vmem:[%s6541_s14 + $0x38] sm:$0xff] %vm123_vm0, %v3327_v21  ;;  %v3322_v24 = vadd.f32 %v6205_v54, %v3321_v22 }
 0x4c2   :  { %v4986_v25 = vpop.f32.mrf.mxu1 }
 0x4c3   :  { %3616 = vst.msk [vmem:[%s6541_s14 + $0x30] sm:$0xff] %vm123_vm0, %v3322_v24  ;;  %v3337_v26 = vadd.f32 %v4986_v25, %v6205_v54 }
 0x4c4   :  { %v3331_v27 = vpop.f32.mrf.mxu1 }
 0x4c5   :  { %3619 = vst.msk [vmem:[%s6541_s14 + $0x48] sm:$0xff] %vm123_vm0, %v3337_v26  ;;  %v3332_v28 = vadd.f32 %v6205_v54, %v3331_v27 }
 0x4c6   :  { %v4989_v29 = vpop.f32.mrf.mxu1 }
 0x4c7   :  { %3618 = vst.msk [vmem:[%s6541_s14 + $0x40] sm:$0xff] %vm123_vm0, %v3332_v28  ;;  %v3347_v30 = vadd.f32 %v4989_v29, %v6205_v54 }
 0x4c8   :  { %v3341_v31 = vpop.f32.mrf.mxu1 }
 0x4c9   :  { %3621 = vst.msk [vmem:[%s6541_s14 + $0x58] sm:$0xff] %vm123_vm0, %v3347_v30  ;;  %v3342_v32 = vadd.f32 %v6205_v54, %v3341_v31 }
 0x4ca   :  { %v4992_v33 = vpop.f32.mrf.mxu1 }
 0x4cb   :  { %3620 = vst.msk [vmem:[%s6541_s14 + $0x50] sm:$0xff] %vm123_vm0, %v3342_v32  ;;  %v3357_v34 = vadd.f32 %v4992_v33, %v6205_v54 }
 0x4cc   :  { %v3351_v35 = vpop.f32.mrf.mxu1 }
 0x4cd   :  { %3623 = vst.msk [vmem:[%s6541_s14 + $0x68] sm:$0xff] %vm123_vm0, %v3357_v34  ;;  %v3352_v36 = vadd.f32 %v6205_v54, %v3351_v35 }
 0x4ce   :  { %v4995_v37 = vpop.f32.mrf.mxu1 }
 0x4cf   :  { %3622 = vst.msk [vmem:[%s6541_s14 + $0x60] sm:$0xff] %vm123_vm0, %v3352_v36  ;;  %v3367_v38 = vadd.f32 %v4995_v37, %v6205_v54 }
 0x4d0   :  { %v3361_v39 = vpop.f32.mrf.mxu1 }
 0x4d1   :  { %3625 = vst.msk [vmem:[%s6541_s14 + $0x78] sm:$0xff] %vm123_vm0, %v3367_v38  ;;  %v3362_v23 = vadd.f32 %v6205_v54, %v3361_v39 }
 0x4d2   :  { %v4998_v40 = vpop.f32.mrf.mxu1 }
 0x4d3   :  { %3624 = vst.msk [vmem:[%s6541_s14 + $0x70] sm:$0xff] %vm123_vm0, %v3362_v23  ;;  %v3377_v42 = vadd.f32 %v4998_v40, %v6205_v54 }
 0x4d4   :  { %v3371_v43 = vpop.f32.mrf.mxu1 }
 0x4d5   :  { %3627 = vst.msk [vmem:[%s6541_s14 + $0x88] sm:$0xff] %vm123_vm0, %v3377_v42  ;;  %v3372_v44 = vadd.f32 %v6205_v54, %v3371_v43 }
 0x4d6   :  { %v5001_v45 = vpop.f32.mrf.mxu1 }
 0x4d7   :  { %3626 = vst.msk [vmem:[%s6541_s14 + $0x80] sm:$0xff] %vm123_vm0, %v3372_v44  ;;  %v3387_v46 = vadd.f32 %v5001_v45, %v6205_v54 }
 0x4d8   :  { %v3381_v47 = vpop.f32.mrf.mxu1 }
 0x4d9   :  { %3629 = vst.msk [vmem:[%s6541_s14 + $0x98] sm:$0xff] %vm123_vm0, %v3387_v46  ;;  %v3382_v48 = vadd.f32 %v6205_v54, %v3381_v47 }
 0x4da   :  { %v5004_v49 = vpop.f32.mrf.mxu1 }
 0x4db   :  { %3628 = vst.msk [vmem:[%s6541_s14 + $0x90] sm:$0xff] %vm123_vm0, %v3382_v48  ;;  %v3397_v50 = vadd.f32 %v5004_v49, %v6205_v54 }
 0x4dc   :  { %v3391_v41 = vpop.f32.mrf.mxu1 }
 0x4dd   :  { %3631 = vst.msk [vmem:[%s6541_s14 + $0xa8] sm:$0xff] %vm123_vm0, %v3397_v50  ;;  %v3392_v51 = vadd.f32 %v6205_v54, %v3391_v41 }
 0x4de   :  { %v5007_v52 = vpop.f32.mrf.mxu1 }
 0x4df   :  { %3630 = vst.msk [vmem:[%s6541_s14 + $0xa0] sm:$0xff] %vm123_vm0, %v3392_v51  ;;  %v3407_v53 = vadd.f32 %v5007_v52, %v6205_v54 }
 0x4e0   :  { %v3401_v55 = vpop.f32.mrf.mxu1 }
 0x4e1   :  { %3633 = vst.msk [vmem:[%s6541_s14 + $0xb8] sm:$0xff] %vm123_vm0, %v3407_v53  ;;  %v3402_v56 = vadd.f32 %v6205_v54, %v3401_v55 }
 0x4e2   :  { %v5010_v57 = vpop.f32.mrf.mxu1 }
 0x4e3   :  { %3632 = vst.msk [vmem:[%s6541_s14 + $0xb0] sm:$0xff] %vm123_vm0, %v3402_v56  ;;  %v3417_v58 = vadd.f32 %v5010_v57, %v6205_v54 }
 0x4e4   :  { %v3411_v59 = vpop.f32.mrf.mxu1 }
 0x4e5   :  { %3635 = vst.msk [vmem:[%s6541_s14 + $0xc8] sm:$0xff] %vm123_vm0, %v3417_v58  ;;  %v3412_v60 = vadd.f32 %v6205_v54, %v3411_v59 }
 0x4e6   :  { %v5013_v61 = vpop.f32.mrf.mxu1 }
 0x4e7   :  { %3634 = vst.msk [vmem:[%s6541_s14 + $0xc0] sm:$0xff] %vm123_vm0, %v3412_v60  ;;  %v3427_v62 = vadd.f32 %v5013_v61, %v6205_v54 }
 0x4e8   :  { %v3421_v63 = vpop.f32.mrf.mxu1 }
 0x4e9   :  { %3637 = vst.msk [vmem:[%s6541_s14 + $0xd8] sm:$0xff] %vm123_vm0, %v3427_v62  ;;  %v3422_v0 = vadd.f32 %v6205_v54, %v3421_v63 }
 0x4ea   :  { %v5016_v1 = vpop.f32.mrf.mxu1 }
 0x4eb   :  { %3636 = vst.msk [vmem:[%s6541_s14 + $0xd0] sm:$0xff] %vm123_vm0, %v3422_v0  ;;  %v3437_v2 = vadd.f32 %v5016_v1, %v6205_v54 }
 0x4ec   :  { %v3431_v3 = vpop.f32.mrf.mxu1 }
 0x4ed   :  { %3639 = vst.msk [vmem:[%s6541_s14 + $0xe8] sm:$0xff] %vm123_vm0, %v3437_v2  ;;  %v3432_v4 = vadd.f32 %v6205_v54, %v3431_v3 }
 0x4ee   :  { %v5019_v6 = vpop.f32.mrf.mxu1 }
 0x4ef   :  { %3638 = vst.msk [vmem:[%s6541_s14 + $0xe0] sm:$0xff] %vm123_vm0, %v3432_v4  ;;  %v3447_v7 = vadd.f32 %v5019_v6, %v6205_v54 }
 0x4f0   :  { %v3441_v8 = vpop.f32.mrf.mxu1 }
 0x4f1   :  { %3641 = vst.msk [vmem:[%s6541_s14 + $0xf8] sm:$0xff] %vm123_vm0, %v3447_v7  ;;  %v3442_v9 = vadd.f32 %v6205_v54, %v3441_v8 }
 0x4f2   :  { %v5022_v10 = vpop.f32.mrf.mxu1 }
 0x4f3   :  { %3640 = vst.msk [vmem:[%s6541_s14 + $0xf0] sm:$0xff] %vm123_vm0, %v3442_v9  ;;  %v3457_v11 = vadd.f32 %v5022_v10, %v6205_v54 }
 0x4f4   :  { %v3451_v5 = vpop.f32.mrf.mxu1 }
 0x4f5   :  { %3643 = vst.msk [vmem:[%s6541_s14 + $0x108] sm:$0xff] %vm123_vm0, %v3457_v11  ;;  %v3452_v12 = vadd.f32 %v6205_v54, %v3451_v5 }
 0x4f6   :  { %v5025_v13 = vpop.f32.mrf.mxu1 }
 0x4f7   :  { %3642 = vst.msk [vmem:[%s6541_s14 + $0x100] sm:$0xff] %vm123_vm0, %v3452_v12  ;;  %v3467_v14 = vadd.f32 %v5025_v13, %v6205_v54 }
 0x4f8   :  { %v3461_v15 = vpop.f32.mrf.mxu1 }
 0x4f9   :  { %3645 = vst.msk [vmem:[%s6541_s14 + $0x118] sm:$0xff] %vm123_vm0, %v3467_v14  ;;  %v3462_v16 = vadd.f32 %v6205_v54, %v3461_v15 }
 0x4fa   :  { %v5028_v17 = vpop.f32.mrf.mxu1 }
 0x4fb   :  { %3644 = vst.msk [vmem:[%s6541_s14 + $0x110] sm:$0xff] %vm123_vm0, %v3462_v16  ;;  %v3477_v18 = vadd.f32 %v5028_v17, %v6205_v54 }
 0x4fc   :  { %v3471_v19 = vpop.f32.mrf.mxu1 }
 0x4fd   :  { %3647 = vst.msk [vmem:[%s6541_s14 + $0x128] sm:$0xff] %vm123_vm0, %v3477_v18  ;;  %v3472_v20 = vadd.f32 %v6205_v54, %v3471_v19 }
 0x4fe   :  { %v5031_v21 = vpop.f32.mrf.mxu1 }
 0x4ff   :  { %3646 = vst.msk [vmem:[%s6541_s14 + $0x120] sm:$0xff] %vm123_vm0, %v3472_v20  ;;  %v3487_v22 = vadd.f32 %v5031_v21, %v6205_v54 }
 0x500   :  { %v3481_v24 = vpop.f32.mrf.mxu1 }
 0x501   :  { %3649 = vst.msk [vmem:[%s6541_s14 + $0x138] sm:$0xff] %vm123_vm0, %v3487_v22  ;;  %v3482_v25 = vadd.f32 %v6205_v54, %v3481_v24 }
 0x502   :  { %v5034_v26 = vpop.f32.mrf.mxu1 }
 0x503   :  { %3648 = vst.msk [vmem:[%s6541_s14 + $0x130] sm:$0xff] %vm123_vm0, %v3482_v25  ;;  %v3497_v27 = vadd.f32 %v5034_v26, %v6205_v54 }
 0x504   :  { %v3491_v28 = vpop.f32.mrf.mxu1 }
 0x505   :  { %3651 = vst.msk [vmem:[%s6541_s14 + $0x148] sm:$0xff] %vm123_vm0, %v3497_v27  ;;  %v3492_v29 = vadd.f32 %v6205_v54, %v3491_v28 }
 0x506   :  { %v5037_v30 = vpop.f32.mrf.mxu1 }
 0x507   :  { %3650 = vst.msk [vmem:[%s6541_s14 + $0x140] sm:$0xff] %vm123_vm0, %v3492_v29  ;;  %v3507_v31 = vadd.f32 %v5037_v30, %v6205_v54 }
 0x508   :  { %v3501_v32 = vpop.f32.mrf.mxu1 }
 0x509   :  { %3653 = vst.msk [vmem:[%s6541_s14 + $0x158] sm:$0xff] %vm123_vm0, %v3507_v31  ;;  %v3502_v33 = vadd.f32 %v6205_v54, %v3501_v32 }
 0x50a   :  { %v5040_v34 = vpop.f32.mrf.mxu1 }
 0x50b   :  { %3652 = vst.msk [vmem:[%s6541_s14 + $0x150] sm:$0xff] %vm123_vm0, %v3502_v33  ;;  %v3517_v35 = vadd.f32 %v5040_v34, %v6205_v54 }
 0x50c   :  { %v3511_v36 = vpop.f32.mrf.mxu1 }
 0x50d   :  { %3655 = vst.msk [vmem:[%s6541_s14 + $0x168] sm:$0xff] %vm123_vm0, %v3517_v35  ;;  %v3512_v37 = vadd.f32 %v6205_v54, %v3511_v36 }
 0x50e   :  { %v5043_v38 = vpop.f32.mrf.mxu1 }
 0x50f   :  { %3654 = vst.msk [vmem:[%s6541_s14 + $0x160] sm:$0xff] %vm123_vm0, %v3512_v37  ;;  %v3527_v39 = vadd.f32 %v5043_v38, %v6205_v54 }
 0x510   :  { %v3521_v23 = vpop.f32.mrf.mxu1 }
 0x511   :  { %3657 = vst.msk [vmem:[%s6541_s14 + $0x178] sm:$0xff] %vm123_vm0, %v3527_v39  ;;  %v3522_v40 = vadd.f32 %v6205_v54, %v3521_v23 }
 0x512   :  { %v5046_v42 = vpop.f32.mrf.mxu1 }
 0x513   :  { %3656 = vst.msk [vmem:[%s6541_s14 + $0x170] sm:$0xff] %vm123_vm0, %v3522_v40  ;;  %v3537_v43 = vadd.f32 %v5046_v42, %v6205_v54 }
 0x514   :  { %v3531_v44 = vpop.f32.mrf.mxu1 }
 0x515   :  { %3659 = vst.msk [vmem:[%s6541_s14 + $0x188] sm:$0xff] %vm123_vm0, %v3537_v43  ;;  %v3532_v45 = vadd.f32 %v6205_v54, %v3531_v44 }
 0x516   :  { %v5049_v46 = vpop.f32.mrf.mxu1 }
 0x517   :  { %3658 = vst.msk [vmem:[%s6541_s14 + $0x180] sm:$0xff] %vm123_vm0, %v3532_v45  ;;  %v3547_v47 = vadd.f32 %v5049_v46, %v6205_v54 }
 0x518   :  { %v3541_v48 = vpop.f32.mrf.mxu1 }
 0x519   :  { %3661 = vst.msk [vmem:[%s6541_s14 + $0x198] sm:$0xff] %vm123_vm0, %v3547_v47  ;;  %v3542_v49 = vadd.f32 %v6205_v54, %v3541_v48 }
 0x51a   :  { %v5052_v50 = vpop.f32.mrf.mxu1 }
 0x51b   :  { %3660 = vst.msk [vmem:[%s6541_s14 + $0x190] sm:$0xff] %vm123_vm0, %v3542_v49  ;;  %v3557_v41 = vadd.f32 %v5052_v50, %v6205_v54 }
 0x51c   :  { %v3551_v51 = vpop.f32.mrf.mxu1 }
 0x51d   :  { %3663 = vst.msk [vmem:[%s6541_s14 + $0x1a8] sm:$0xff] %vm123_vm0, %v3557_v41  ;;  %v3552_v52 = vadd.f32 %v6205_v54, %v3551_v51 }
 0x51e   :  { %v5055_v53 = vpop.f32.mrf.mxu1 }
 0x51f   :  { %3662 = vst.msk [vmem:[%s6541_s14 + $0x1a0] sm:$0xff] %vm123_vm0, %v3552_v52  ;;  %v3567_v55 = vadd.f32 %v5055_v53, %v6205_v54 }
 0x520   :  { %v3561_v56 = vpop.f32.mrf.mxu1 }
 0x521   :  { %3665 = vst.msk [vmem:[%s6541_s14 + $0x1b8] sm:$0xff] %vm123_vm0, %v3567_v55  ;;  %v3562_v57 = vadd.f32 %v6205_v54, %v3561_v56 }
 0x522   :  { %v5058_v58 = vpop.f32.mrf.mxu1 }
 0x523   :  { %3664 = vst.msk [vmem:[%s6541_s14 + $0x1b0] sm:$0xff] %vm123_vm0, %v3562_v57  ;;  %v3577_v59 = vadd.f32 %v5058_v58, %v6205_v54 }
 0x524   :  { %v3571_v60 = vpop.f32.mrf.mxu1 }
 0x525   :  { %3667 = vst.msk [vmem:[%s6541_s14 + $0x1c8] sm:$0xff] %vm123_vm0, %v3577_v59  ;;  %v3572_v61 = vadd.f32 %v6205_v54, %v3571_v60 }
 0x526   :  { %v5061_v62 = vpop.f32.mrf.mxu1 }
 0x527   :  { %3666 = vst.msk [vmem:[%s6541_s14 + $0x1c0] sm:$0xff] %vm123_vm0, %v3572_v61  ;;  %v3587_v63 = vadd.f32 %v5061_v62, %v6205_v54 }
 0x528   :  { %v3581_v0 = vpop.f32.mrf.mxu1 }
 0x529   :  { %3669 = vst.msk [vmem:[%s6541_s14 + $0x1d8] sm:$0xff] %vm123_vm0, %v3587_v63  ;;  %v3582_v1 = vadd.f32 %v6205_v54, %v3581_v0 }
 0x52a   :  { %v5064_v2 = vpop.f32.mrf.mxu1 }
 0x52b   :  { %3668 = vst.msk [vmem:[%s6541_s14 + $0x1d0] sm:$0xff] %vm123_vm0, %v3582_v1  ;;  %v3597_v3 = vadd.f32 %v5064_v2, %v6205_v54 }
 0x52c   :  { %v3591_v4 = vpop.f32.mrf.mxu1 }
 0x52d   :  { %3671 = vst.msk [vmem:[%s6541_s14 + $0x1e8] sm:$0xff] %vm123_vm0, %v3597_v3  ;;  %v3592_v6 = vadd.f32 %v6205_v54, %v3591_v4 }
 0x52e   :  { %v5067_v7 = vpop.f32.mrf.mxu1 }
 0x52f   :  { %3670 = vst.msk [vmem:[%s6541_s14 + $0x1e0] sm:$0xff] %vm123_vm0, %v3592_v6  ;;  %v3607_v8 = vadd.f32 %v5067_v7, %v6205_v54 }
 0x530   :  { %v3601_v9 = vpop.f32.mrf.mxu1 }
 0x531   :  { %3673 = vst.msk [vmem:[%s6541_s14 + $0x1f8] sm:$0xff] %vm123_vm0, %v3607_v8  ;;  %v3602_v10 = vadd.f32 %v6205_v54, %v3601_v9 }
 0x533   :  { %3672 = vst.msk [vmem:[%s6541_s14 + $0x1f0] sm:$0xff] %vm123_vm0, %v3602_v10 }

</bundles_post_ra>
